<compile_context>
chip_gen: v6e
topology: v6e:2x2x1
jax: 0.10.0
libtpu: 0.0.40
codegen_flags: <defaults>
</compile_context>

<pallas_src>
import functools

import jax
import jax.numpy as jnp
import numpy as np
from jax.experimental import pallas as pl
from jax.experimental.pallas import tpu as pltpu


# ----------------------------------------------------------------------------
# Fused SpatialAttention kernel
# ----------------------------------------------------------------------------
def _spatial_attention_kernel(x_ref, w_ref, cmask_ref, rmask_ref, o_ref,
                              sum_ref, max_ref, *, ksize, height, width, channels):
    # x_ref:     (1, Ct, H*W)   lane-dense channel tile of one batch element
    # w_ref:     (2*K*K,)       conv taps in SMEM, index = ci*K*K + dy*K + dx
    # cmask_ref: (K, H*W)       0/1 column-validity mask per dx (zero padding)
    # rmask_ref: (K, H*W)       0/1 row-validity mask per dy
    # o_ref:     (1, 1, H*W)    sigmoid attention map (flat, lane-dense)
    # sum_ref/max_ref: (1, H*W) running channel sum / max across C tiles
    K = ksize
    P = K // 2
    H, W = height, width
    HW = H * W
    C = channels

    c_step = pl.program_id(1)
    last_c = pl.num_programs(1) - 1

    # ---- lane-dense partial channel reduction over this C tile (no serial
    #      per-channel carry: whole-slab reduce fills the VALU slots). ----
    xt = x_ref[0].astype(jnp.float32)              # (Ct, HW)
    psum = jnp.sum(xt, axis=0, keepdims=True)      # (1, HW)
    pmax = jnp.max(xt, axis=0, keepdims=True)      # (1, HW)

    @pl.when(c_step == 0)
    def _():
        sum_ref[...] = psum
        max_ref[...] = pmax

    @pl.when(c_step > 0)
    def _():
        sum_ref[...] = sum_ref[...] + psum
        max_ref[...] = jnp.maximum(max_ref[...], pmax)

    # ---- finalize on the last C step: 7x7 conv in flat space via lane rolls
    #      + masked scalar-weight FMAs, then sigmoid, dense output store. ----
    @pl.when(c_step == last_c)
    def _():
        avg = sum_ref[...] * (1.0 / C)             # (1, HW)
        mx = max_ref[...]                          # (1, HW)

        # Column taps: r_dx(p) = pooled(p + dx - P) * [source column in range].
        # Row taps folded afterwards via rolls by multiples of W.
        t = [None] * K                             # per-dy row-convolved maps
        for ci, pooled in enumerate((avg, mx)):
            for dx in range(K):
                shift = (P - dx) % HW              # jnp.roll convention: out[i] = in[i - shift]
                rolled = pltpu.roll(pooled, shift, axis=1) if shift else pooled
                r = rolled * cmask_ref[dx]
                for dy in range(K):
                    w = w_ref[ci * K * K + dy * K + dx]   # scalar from SMEM
                    contrib = w * r
                    t[dy] = contrib if t[dy] is None else t[dy] + contrib

        acc = None
        for dy in range(K):
            shift = ((P - dy) * W) % HW
            rolled = pltpu.roll(t[dy], shift, axis=1) if shift else t[dy]
            contrib = rolled * rmask_ref[dy]
            acc = contrib if acc is None else acc + contrib

        # Exact sigmoid (EUP exp + f32 divide) for parity with the f32 reference.
        att = 1.0 / (1.0 + jnp.exp(-acc))
        o_ref[0] = att.astype(o_ref.dtype)


def _choose_c_tile(C, HW, bytes_per_elem, vmem_budget=8 << 20):
    """Largest channel tile (multiple of 8 dividing C, or all of C) whose
    double-buffered (Ct, HW) x block stays within a modest VMEM budget."""
    max_ct = max(1, vmem_budget // (2 * bytes_per_elem * HW))
    if C <= max_ct:
        return C
    best = None
    ct = 8
    while ct <= min(C - 1, max_ct):
        if C % ct == 0:
            best = ct
        ct += 8
    return best if best is not None else C  # fallback: whole C (vmem_limit raised)


def spatial_attention_pallas(x, weight):
    """x: (B, C, H, W).  weight: (1, 2, K, K) conv weight (bias=False).

    Returns the (B, 1, H, W) sigmoid spatial-attention map (dtype follows x).
    """
    B, C, H, W = x.shape
    K = weight.shape[-1]
    P = K // 2
    assert weight.shape == (1, 2, K, K)
    HW = H * W

    ct = _choose_c_tile(C, HW, x.dtype.itemsize)
    n_ct = C // ct

    # Lane-dense views: free reshapes of contiguous NCHW in HBM.
    x_flat = x.reshape(B, C, HW)

    # Conv taps as flat scalars for SMEM.
    w_flat = weight.astype(jnp.float32).reshape(2 * K * K)

    # Static 0/1 validity masks for the zero-padded KxK conv, built once on host:
    #   colmask[dx, p] = 1 iff (p %  W) + dx - P in [0, W)
    #   rowmask[dy, p] = 1 iff (p // W) + dy - P in [0, H)
    pos = np.arange(HW)
    wi = pos % W
    hi = pos // W
    taps = np.arange(K)[:, None] - P
    colmask = jnp.asarray(((wi[None, :] + taps) >= 0) & ((wi[None, :] + taps) < W),
                          jnp.float32)
    rowmask = jnp.asarray(((hi[None, :] + taps) >= 0) & ((hi[None, :] + taps) < H),
                          jnp.float32)

    kernel = functools.partial(_spatial_attention_kernel, ksize=K, height=H,
                               width=W, channels=C)
    out_flat = pl.pallas_call(
        kernel,
        out_shape=jax.ShapeDtypeStruct((B, 1, HW), x.dtype),
        grid_spec=pltpu.PrefetchScalarGridSpec(
            num_scalar_prefetch=0,
            grid=(B, n_ct),
            in_specs=[
                pl.BlockSpec((1, ct, HW), lambda b, c: (b, c, 0)),       # x tile
                pl.BlockSpec(memory_space=pltpu.MemorySpace.SMEM),        # weights
                pl.BlockSpec((K, HW), lambda b, c: (0, 0)),               # colmask
                pl.BlockSpec((K, HW), lambda b, c: (0, 0)),               # rowmask
            ],
            out_specs=pl.BlockSpec((1, 1, HW), lambda b, c: (b, 0, 0)),
            scratch_shapes=[pltpu.VMEM((1, HW), jnp.float32),
                            pltpu.VMEM((1, HW), jnp.float32)],
        ),
        compiler_params=pltpu.CompilerParams(
            dimension_semantics=("parallel", "arbitrary"),
            vmem_limit_bytes=48 * 1024 * 1024,
        ),
    )(x_flat, w_flat, colmask, rowmask)
    return out_flat.reshape(B, 1, H, W)


# ----------------------------------------------------------------------------
# Pure-JAX reference (correctness check only)
# ----------------------------------------------------------------------------
def spatial_attention_ref(x, weight):
    K = weight.shape[-1]
    P = K // 2
    avg = jnp.mean(x, axis=1, keepdims=True)
    mx = jnp.max(x, axis=1, keepdims=True)
    cat = jnp.concatenate([avg, mx], axis=1)
    out = jax.lax.conv_general_dilated(
        cat, weight.astype(jnp.float32), window_strides=(1, 1),
        padding=((P, P), (P, P)),
        dimension_numbers=("NCHW", "OIHW", "NCHW"),
        precision=jax.lax.Precision.HIGHEST)
    return 1.0 / (1.0 + jnp.exp(-out))


if __name__ == "__main__":
    key = jax.random.PRNGKey(0)
    kx, kw = jax.random.split(key)
    B, C, H, W = 2, 4, 16, 16
    K = 7
    x = jax.random.normal(kx, (B, C, H, W), jnp.float32)
    # nn.Conv2d(2, 1, 7, padding=3, bias=False) weight, deterministic init
    weight = jax.random.normal(kw, (1, 2, K, K), jnp.float32) / np.sqrt(2 * K * K)

    y = spatial_attention_pallas(x, weight)
    jax.block_until_ready(y)

    y_ref = spatial_attention_ref(x, weight)
    np.testing.assert_allclose(np.asarray(y), np.asarray(y_ref),
                               rtol=1e-4, atol=1e-5)

    print("KERNEL_OK")
</pallas_src>

<mosaic_0001>
module attributes {stable_mosaic.version = 11 : i64} {
  func.func @_spatial_attention_kernel(%arg0: i32, %arg1: i32, %arg2: memref<1x4x256xf32, #tpu.memory_space<vmem>>, %arg3: memref<98xf32, #tpu.memory_space<smem>>, %arg4: memref<7x256xf32, #tpu.memory_space<vmem>>, %arg5: memref<7x256xf32, #tpu.memory_space<vmem>>, %arg6: memref<1x1x256xf32, #tpu.memory_space<vmem>>, %arg7: memref<1x256xf32, #tpu.memory_space<vmem>>, %arg8: memref<1x256xf32, #tpu.memory_space<vmem>>) attributes {dimension_semantics = [#tpu.dimension_semantics<parallel>, #tpu.dimension_semantics<arbitrary>], iteration_bounds = array<i64: 2, 1>, scalar_prefetch = 0 : i64, scratch_operands = 2 : i64, tpu.core_type = #tpu.core_type<tc>, window_params = [{transform_indices = @transform_0, window_bounds = array<i64: 1, 4, 256>}, {transform_indices = @transform_1, window_bounds = array<i64: 98>}, {pipeline_mode = #tpu.pipeline_mode<synchronous>, transform_indices = @transform_2, window_bounds = array<i64: 7, 256>}, {pipeline_mode = #tpu.pipeline_mode<synchronous>, transform_indices = @transform_3, window_bounds = array<i64: 7, 256>}, {transform_indices = @transform_4, window_bounds = array<i64: 1, 1, 256>}]} {
    %c0 = arith.constant 0 : index
    %c0_0 = arith.constant 0 : index
    %c0_1 = arith.constant 0 : index
    %0 = vector.load %arg2[%c0, %c0_0, %c0_1] : memref<1x4x256xf32, #tpu.memory_space<vmem>>, vector<1x4x256xf32>
    %1 = vector.shape_cast %0 : vector<1x4x256xf32> to vector<4x256xf32>
    %cst = arith.constant dense<0.000000e+00> : vector<256xf32>
    %2 = vector.multi_reduction <add>, %1, %cst [0] : vector<4x256xf32> to vector<256xf32>
    %3 = vector.shape_cast %2 : vector<256xf32> to vector<1x256xf32>
    %cst_2 = arith.constant dense<0xFF800000> : vector<256xf32>
    %4 = vector.multi_reduction <maximumf>, %1, %cst_2 [0] : vector<4x256xf32> to vector<256xf32>
    %5 = vector.shape_cast %4 : vector<256xf32> to vector<1x256xf32>
    %c0_i32 = arith.constant 0 : i32
    %6 = arith.cmpi eq, %arg1, %c0_i32 : i32
    %7 = arith.extui %6 : i1 to i32
    %c0_i32_3 = arith.constant 0 : i32
    %8 = arith.cmpi ne, %7, %c0_i32_3 : i32
    scf.if %8 {
      %c0_8 = arith.constant 0 : index
      %c0_9 = arith.constant 0 : index
      %15 = vector.load %arg7[%c0_8, %c0_9] : memref<1x256xf32, #tpu.memory_space<vmem>>, vector<1x256xf32>
      tpu.vector_store %arg7[%c0_8, %c0_9], %3 {strides = array<i32>} : memref<1x256xf32, #tpu.memory_space<vmem>>, vector<1x256xf32>,
      %c0_10 = arith.constant 0 : index
      %c0_11 = arith.constant 0 : index
      %16 = vector.load %arg8[%c0_10, %c0_11] : memref<1x256xf32, #tpu.memory_space<vmem>>, vector<1x256xf32>
      tpu.vector_store %arg8[%c0_10, %c0_11], %5 {strides = array<i32>} : memref<1x256xf32, #tpu.memory_space<vmem>>, vector<1x256xf32>,
    } else {
    }
    %c0_i32_4 = arith.constant 0 : i32
    %9 = arith.cmpi sgt, %arg1, %c0_i32_4 : i32
    %10 = arith.extui %9 : i1 to i32
    %c0_i32_5 = arith.constant 0 : i32
    %11 = arith.cmpi ne, %10, %c0_i32_5 : i32
    scf.if %11 {
      %c0_8 = arith.constant 0 : index
      %c0_9 = arith.constant 0 : index
      %15 = vector.load %arg7[%c0_8, %c0_9] : memref<1x256xf32, #tpu.memory_space<vmem>>, vector<1x256xf32>
      %16 = arith.addf %15, %3 : vector<1x256xf32>
      %c0_10 = arith.constant 0 : index
      %c0_11 = arith.constant 0 : index
      %17 = vector.load %arg7[%c0_10, %c0_11] : memref<1x256xf32, #tpu.memory_space<vmem>>, vector<1x256xf32>
      tpu.vector_store %arg7[%c0_10, %c0_11], %16 {strides = array<i32>} : memref<1x256xf32, #tpu.memory_space<vmem>>, vector<1x256xf32>,
      %c0_12 = arith.constant 0 : index
      %c0_13 = arith.constant 0 : index
      %18 = vector.load %arg8[%c0_12, %c0_13] : memref<1x256xf32, #tpu.memory_space<vmem>>, vector<1x256xf32>
      %19 = arith.maximumf %18, %5 : vector<1x256xf32>
      %c0_14 = arith.constant 0 : index
      %c0_15 = arith.constant 0 : index
      %20 = vector.load %arg8[%c0_14, %c0_15] : memref<1x256xf32, #tpu.memory_space<vmem>>, vector<1x256xf32>
      tpu.vector_store %arg8[%c0_14, %c0_15], %19 {strides = array<i32>} : memref<1x256xf32, #tpu.memory_space<vmem>>, vector<1x256xf32>,
    } else {
    }
    %c0_i32_6 = arith.constant 0 : i32
    %12 = arith.cmpi eq, %arg1, %c0_i32_6 : i32
    %13 = arith.extui %12 : i1 to i32
    %c0_i32_7 = arith.constant 0 : i32
    %14 = arith.cmpi ne, %13, %c0_i32_7 : i32
    scf.if %14 {
      %c0_8 = arith.constant 0 : index
      %c0_9 = arith.constant 0 : index
      %15 = vector.load %arg7[%c0_8, %c0_9] : memref<1x256xf32, #tpu.memory_space<vmem>>, vector<1x256xf32>
      %cst_10 = arith.constant 2.500000e-01 : f32
      %16 = vector.broadcast %cst_10 : f32 to vector<1x256xf32>
      %17 = arith.mulf %15, %16 : vector<1x256xf32>
      %c0_11 = arith.constant 0 : index
      %c0_12 = arith.constant 0 : index
      %18 = vector.load %arg8[%c0_11, %c0_12] : memref<1x256xf32, #tpu.memory_space<vmem>>, vector<1x256xf32>
      %c3_i32 = arith.constant 3 : i32
      %19 = tpu.dynamic_rotate %17 by %c3_i32 dim 1 : vector<1x256xf32>, i32 -> vector<1x256xf32>
      %c0_13 = arith.constant 0 : index
      %c0_14 = arith.constant 0 : index
      %20 = vector.load %arg4[%c0_13, %c0_14] : memref<7x256xf32, #tpu.memory_space<vmem>>, vector<1x256xf32>
      %21 = vector.shape_cast %20 : vector<1x256xf32> to vector<256xf32>
      %22 = vector.shape_cast %21 : vector<256xf32> to vector<1x256xf32>
      %23 = arith.mulf %19, %22 : vector<1x256xf32>
      %c0_15 = arith.constant 0 : index
      %24 = memref.load %arg3[%c0_15] : memref<98xf32, #tpu.memory_space<smem>>
      %25 = vector.broadcast %24 : f32 to vector<1x256xf32>
      %26 = arith.mulf %25, %23 : vector<1x256xf32>
      %c7 = arith.constant 7 : index
      %27 = memref.load %arg3[%c7] : memref<98xf32, #tpu.memory_space<smem>>
      %28 = vector.broadcast %27 : f32 to vector<1x256xf32>
      %29 = arith.mulf %28, %23 : vector<1x256xf32>
      %c14 = arith.constant 14 : index
      %30 = memref.load %arg3[%c14] : memref<98xf32, #tpu.memory_space<smem>>
      %31 = vector.broadcast %30 : f32 to vector<1x256xf32>
      %32 = arith.mulf %31, %23 : vector<1x256xf32>
      %c21 = arith.constant 21 : index
      %33 = memref.load %arg3[%c21] : memref<98xf32, #tpu.memory_space<smem>>
      %34 = vector.broadcast %33 : f32 to vector<1x256xf32>
      %35 = arith.mulf %34, %23 : vector<1x256xf32>
      %c28 = arith.constant 28 : index
      %36 = memref.load %arg3[%c28] : memref<98xf32, #tpu.memory_space<smem>>
      %37 = vector.broadcast %36 : f32 to vector<1x256xf32>
      %38 = arith.mulf %37, %23 : vector<1x256xf32>
      %c35 = arith.constant 35 : index
      %39 = memref.load %arg3[%c35] : memref<98xf32, #tpu.memory_space<smem>>
      %40 = vector.broadcast %39 : f32 to vector<1x256xf32>
      %41 = arith.mulf %40, %23 : vector<1x256xf32>
      %c42 = arith.constant 42 : index
      %42 = memref.load %arg3[%c42] : memref<98xf32, #tpu.memory_space<smem>>
      %43 = vector.broadcast %42 : f32 to vector<1x256xf32>
      %44 = arith.mulf %43, %23 : vector<1x256xf32>
      %c2_i32 = arith.constant 2 : i32
      %45 = tpu.dynamic_rotate %17 by %c2_i32 dim 1 : vector<1x256xf32>, i32 -> vector<1x256xf32>
      %c1 = arith.constant 1 : index
      %c0_16 = arith.constant 0 : index
      %46 = vector.load %arg4[%c1, %c0_16] : memref<7x256xf32, #tpu.memory_space<vmem>>, vector<1x256xf32>
      %47 = vector.shape_cast %46 : vector<1x256xf32> to vector<256xf32>
      %48 = vector.shape_cast %47 : vector<256xf32> to vector<1x256xf32>
      %49 = arith.mulf %45, %48 : vector<1x256xf32>
      %c1_17 = arith.constant 1 : index
      %50 = memref.load %arg3[%c1_17] : memref<98xf32, #tpu.memory_space<smem>>
      %51 = vector.broadcast %50 : f32 to vector<1x256xf32>
      %52 = arith.mulf %51, %49 : vector<1x256xf32>
      %53 = arith.addf %26, %52 : vector<1x256xf32>
      %c8 = arith.constant 8 : index
      %54 = memref.load %arg3[%c8] : memref<98xf32, #tpu.memory_space<smem>>
      %55 = vector.broadcast %54 : f32 to vector<1x256xf32>
      %56 = arith.mulf %55, %49 : vector<1x256xf32>
      %57 = arith.addf %29, %56 : vector<1x256xf32>
      %c15 = arith.constant 15 : index
      %58 = memref.load %arg3[%c15] : memref<98xf32, #tpu.memory_space<smem>>
      %59 = vector.broadcast %58 : f32 to vector<1x256xf32>
      %60 = arith.mulf %59, %49 : vector<1x256xf32>
      %61 = arith.addf %32, %60 : vector<1x256xf32>
      %c22 = arith.constant 22 : index
      %62 = memref.load %arg3[%c22] : memref<98xf32, #tpu.memory_space<smem>>
      %63 = vector.broadcast %62 : f32 to vector<1x256xf32>
      %64 = arith.mulf %63, %49 : vector<1x256xf32>
      %65 = arith.addf %35, %64 : vector<1x256xf32>
      %c29 = arith.constant 29 : index
      %66 = memref.load %arg3[%c29] : memref<98xf32, #tpu.memory_space<smem>>
      %67 = vector.broadcast %66 : f32 to vector<1x256xf32>
      %68 = arith.mulf %67, %49 : vector<1x256xf32>
      %69 = arith.addf %38, %68 : vector<1x256xf32>
      %c36 = arith.constant 36 : index
      %70 = memref.load %arg3[%c36] : memref<98xf32, #tpu.memory_space<smem>>
      %71 = vector.broadcast %70 : f32 to vector<1x256xf32>
      %72 = arith.mulf %71, %49 : vector<1x256xf32>
      %73 = arith.addf %41, %72 : vector<1x256xf32>
      %c43 = arith.constant 43 : index
      %74 = memref.load %arg3[%c43] : memref<98xf32, #tpu.memory_space<smem>>
      %75 = vector.broadcast %74 : f32 to vector<1x256xf32>
      %76 = arith.mulf %75, %49 : vector<1x256xf32>
      %77 = arith.addf %44, %76 : vector<1x256xf32>
      %c1_i32 = arith.constant 1 : i32
      %78 = tpu.dynamic_rotate %17 by %c1_i32 dim 1 : vector<1x256xf32>, i32 -> vector<1x256xf32>
      %c2 = arith.constant 2 : index
      %c0_18 = arith.constant 0 : index
      %79 = vector.load %arg4[%c2, %c0_18] : memref<7x256xf32, #tpu.memory_space<vmem>>, vector<1x256xf32>
      %80 = vector.shape_cast %79 : vector<1x256xf32> to vector<256xf32>
      %81 = vector.shape_cast %80 : vector<256xf32> to vector<1x256xf32>
      %82 = arith.mulf %78, %81 : vector<1x256xf32>
      %c2_19 = arith.constant 2 : index
      %83 = memref.load %arg3[%c2_19] : memref<98xf32, #tpu.memory_space<smem>>
      %84 = vector.broadcast %83 : f32 to vector<1x256xf32>
      %85 = arith.mulf %84, %82 : vector<1x256xf32>
      %86 = arith.addf %53, %85 : vector<1x256xf32>
      %c9 = arith.constant 9 : index
      %87 = memref.load %arg3[%c9] : memref<98xf32, #tpu.memory_space<smem>>
      %88 = vector.broadcast %87 : f32 to vector<1x256xf32>
      %89 = arith.mulf %88, %82 : vector<1x256xf32>
      %90 = arith.addf %57, %89 : vector<1x256xf32>
      %c16 = arith.constant 16 : index
      %91 = memref.load %arg3[%c16] : memref<98xf32, #tpu.memory_space<smem>>
      %92 = vector.broadcast %91 : f32 to vector<1x256xf32>
      %93 = arith.mulf %92, %82 : vector<1x256xf32>
      %94 = arith.addf %61, %93 : vector<1x256xf32>
      %c23 = arith.constant 23 : index
      %95 = memref.load %arg3[%c23] : memref<98xf32, #tpu.memory_space<smem>>
      %96 = vector.broadcast %95 : f32 to vector<1x256xf32>
      %97 = arith.mulf %96, %82 : vector<1x256xf32>
      %98 = arith.addf %65, %97 : vector<1x256xf32>
      %c30 = arith.constant 30 : index
      %99 = memref.load %arg3[%c30] : memref<98xf32, #tpu.memory_space<smem>>
      %100 = vector.broadcast %99 : f32 to vector<1x256xf32>
      %101 = arith.mulf %100, %82 : vector<1x256xf32>
      %102 = arith.addf %69, %101 : vector<1x256xf32>
      %c37 = arith.constant 37 : index
      %103 = memref.load %arg3[%c37] : memref<98xf32, #tpu.memory_space<smem>>
      %104 = vector.broadcast %103 : f32 to vector<1x256xf32>
      %105 = arith.mulf %104, %82 : vector<1x256xf32>
      %106 = arith.addf %73, %105 : vector<1x256xf32>
      %c44 = arith.constant 44 : index
      %107 = memref.load %arg3[%c44] : memref<98xf32, #tpu.memory_space<smem>>
      %108 = vector.broadcast %107 : f32 to vector<1x256xf32>
      %109 = arith.mulf %108, %82 : vector<1x256xf32>
      %110 = arith.addf %77, %109 : vector<1x256xf32>
      %c3 = arith.constant 3 : index
      %c0_20 = arith.constant 0 : index
      %111 = vector.load %arg4[%c3, %c0_20] : memref<7x256xf32, #tpu.memory_space<vmem>>, vector<1x256xf32>
      %112 = vector.shape_cast %111 : vector<1x256xf32> to vector<256xf32>
      %113 = vector.shape_cast %112 : vector<256xf32> to vector<1x256xf32>
      %114 = arith.mulf %17, %113 : vector<1x256xf32>
      %c3_21 = arith.constant 3 : index
      %115 = memref.load %arg3[%c3_21] : memref<98xf32, #tpu.memory_space<smem>>
      %116 = vector.broadcast %115 : f32 to vector<1x256xf32>
      %117 = arith.mulf %116, %114 : vector<1x256xf32>
      %118 = arith.addf %86, %117 : vector<1x256xf32>
      %c10 = arith.constant 10 : index
      %119 = memref.load %arg3[%c10] : memref<98xf32, #tpu.memory_space<smem>>
      %120 = vector.broadcast %119 : f32 to vector<1x256xf32>
      %121 = arith.mulf %120, %114 : vector<1x256xf32>
      %122 = arith.addf %90, %121 : vector<1x256xf32>
      %c17 = arith.constant 17 : index
      %123 = memref.load %arg3[%c17] : memref<98xf32, #tpu.memory_space<smem>>
      %124 = vector.broadcast %123 : f32 to vector<1x256xf32>
      %125 = arith.mulf %124, %114 : vector<1x256xf32>
      %126 = arith.addf %94, %125 : vector<1x256xf32>
      %c24 = arith.constant 24 : index
      %127 = memref.load %arg3[%c24] : memref<98xf32, #tpu.memory_space<smem>>
      %128 = vector.broadcast %127 : f32 to vector<1x256xf32>
      %129 = arith.mulf %128, %114 : vector<1x256xf32>
      %130 = arith.addf %98, %129 : vector<1x256xf32>
      %c31 = arith.constant 31 : index
      %131 = memref.load %arg3[%c31] : memref<98xf32, #tpu.memory_space<smem>>
      %132 = vector.broadcast %131 : f32 to vector<1x256xf32>
      %133 = arith.mulf %132, %114 : vector<1x256xf32>
      %134 = arith.addf %102, %133 : vector<1x256xf32>
      %c38 = arith.constant 38 : index
      %135 = memref.load %arg3[%c38] : memref<98xf32, #tpu.memory_space<smem>>
      %136 = vector.broadcast %135 : f32 to vector<1x256xf32>
      %137 = arith.mulf %136, %114 : vector<1x256xf32>
      %138 = arith.addf %106, %137 : vector<1x256xf32>
      %c45 = arith.constant 45 : index
      %139 = memref.load %arg3[%c45] : memref<98xf32, #tpu.memory_space<smem>>
      %140 = vector.broadcast %139 : f32 to vector<1x256xf32>
      %141 = arith.mulf %140, %114 : vector<1x256xf32>
      %142 = arith.addf %110, %141 : vector<1x256xf32>
      %c255_i32 = arith.constant 255 : i32
      %143 = tpu.dynamic_rotate %17 by %c255_i32 dim 1 : vector<1x256xf32>, i32 -> vector<1x256xf32>
      %c4 = arith.constant 4 : index
      %c0_22 = arith.constant 0 : index
      %144 = vector.load %arg4[%c4, %c0_22] : memref<7x256xf32, #tpu.memory_space<vmem>>, vector<1x256xf32>
      %145 = vector.shape_cast %144 : vector<1x256xf32> to vector<256xf32>
      %146 = vector.shape_cast %145 : vector<256xf32> to vector<1x256xf32>
      %147 = arith.mulf %143, %146 : vector<1x256xf32>
      %c4_23 = arith.constant 4 : index
      %148 = memref.load %arg3[%c4_23] : memref<98xf32, #tpu.memory_space<smem>>
      %149 = vector.broadcast %148 : f32 to vector<1x256xf32>
      %150 = arith.mulf %149, %147 : vector<1x256xf32>
      %151 = arith.addf %118, %150 : vector<1x256xf32>
      %c11 = arith.constant 11 : index
      %152 = memref.load %arg3[%c11] : memref<98xf32, #tpu.memory_space<smem>>
      %153 = vector.broadcast %152 : f32 to vector<1x256xf32>
      %154 = arith.mulf %153, %147 : vector<1x256xf32>
      %155 = arith.addf %122, %154 : vector<1x256xf32>
      %c18 = arith.constant 18 : index
      %156 = memref.load %arg3[%c18] : memref<98xf32, #tpu.memory_space<smem>>
      %157 = vector.broadcast %156 : f32 to vector<1x256xf32>
      %158 = arith.mulf %157, %147 : vector<1x256xf32>
      %159 = arith.addf %126, %158 : vector<1x256xf32>
      %c25 = arith.constant 25 : index
      %160 = memref.load %arg3[%c25] : memref<98xf32, #tpu.memory_space<smem>>
      %161 = vector.broadcast %160 : f32 to vector<1x256xf32>
      %162 = arith.mulf %161, %147 : vector<1x256xf32>
      %163 = arith.addf %130, %162 : vector<1x256xf32>
      %c32 = arith.constant 32 : index
      %164 = memref.load %arg3[%c32] : memref<98xf32, #tpu.memory_space<smem>>
      %165 = vector.broadcast %164 : f32 to vector<1x256xf32>
      %166 = arith.mulf %165, %147 : vector<1x256xf32>
      %167 = arith.addf %134, %166 : vector<1x256xf32>
      %c39 = arith.constant 39 : index
      %168 = memref.load %arg3[%c39] : memref<98xf32, #tpu.memory_space<smem>>
      %169 = vector.broadcast %168 : f32 to vector<1x256xf32>
      %170 = arith.mulf %169, %147 : vector<1x256xf32>
      %171 = arith.addf %138, %170 : vector<1x256xf32>
      %c46 = arith.constant 46 : index
      %172 = memref.load %arg3[%c46] : memref<98xf32, #tpu.memory_space<smem>>
      %173 = vector.broadcast %172 : f32 to vector<1x256xf32>
      %174 = arith.mulf %173, %147 : vector<1x256xf32>
      %175 = arith.addf %142, %174 : vector<1x256xf32>
      %c254_i32 = arith.constant 254 : i32
      %176 = tpu.dynamic_rotate %17 by %c254_i32 dim 1 : vector<1x256xf32>, i32 -> vector<1x256xf32>
      %c5 = arith.constant 5 : index
      %c0_24 = arith.constant 0 : index
      %177 = vector.load %arg4[%c5, %c0_24] : memref<7x256xf32, #tpu.memory_space<vmem>>, vector<1x256xf32>
      %178 = vector.shape_cast %177 : vector<1x256xf32> to vector<256xf32>
      %179 = vector.shape_cast %178 : vector<256xf32> to vector<1x256xf32>
      %180 = arith.mulf %176, %179 : vector<1x256xf32>
      %c5_25 = arith.constant 5 : index
      %181 = memref.load %arg3[%c5_25] : memref<98xf32, #tpu.memory_space<smem>>
      %182 = vector.broadcast %181 : f32 to vector<1x256xf32>
      %183 = arith.mulf %182, %180 : vector<1x256xf32>
      %184 = arith.addf %151, %183 : vector<1x256xf32>
      %c12 = arith.constant 12 : index
      %185 = memref.load %arg3[%c12] : memref<98xf32, #tpu.memory_space<smem>>
      %186 = vector.broadcast %185 : f32 to vector<1x256xf32>
      %187 = arith.mulf %186, %180 : vector<1x256xf32>
      %188 = arith.addf %155, %187 : vector<1x256xf32>
      %c19 = arith.constant 19 : index
      %189 = memref.load %arg3[%c19] : memref<98xf32, #tpu.memory_space<smem>>
      %190 = vector.broadcast %189 : f32 to vector<1x256xf32>
      %191 = arith.mulf %190, %180 : vector<1x256xf32>
      %192 = arith.addf %159, %191 : vector<1x256xf32>
      %c26 = arith.constant 26 : index
      %193 = memref.load %arg3[%c26] : memref<98xf32, #tpu.memory_space<smem>>
      %194 = vector.broadcast %193 : f32 to vector<1x256xf32>
      %195 = arith.mulf %194, %180 : vector<1x256xf32>
      %196 = arith.addf %163, %195 : vector<1x256xf32>
      %c33 = arith.constant 33 : index
      %197 = memref.load %arg3[%c33] : memref<98xf32, #tpu.memory_space<smem>>
      %198 = vector.broadcast %197 : f32 to vector<1x256xf32>
      %199 = arith.mulf %198, %180 : vector<1x256xf32>
      %200 = arith.addf %167, %199 : vector<1x256xf32>
      %c40 = arith.constant 40 : index
      %201 = memref.load %arg3[%c40] : memref<98xf32, #tpu.memory_space<smem>>
      %202 = vector.broadcast %201 : f32 to vector<1x256xf32>
      %203 = arith.mulf %202, %180 : vector<1x256xf32>
      %204 = arith.addf %171, %203 : vector<1x256xf32>
      %c47 = arith.constant 47 : index
      %205 = memref.load %arg3[%c47] : memref<98xf32, #tpu.memory_space<smem>>
      %206 = vector.broadcast %205 : f32 to vector<1x256xf32>
      %207 = arith.mulf %206, %180 : vector<1x256xf32>
      %208 = arith.addf %175, %207 : vector<1x256xf32>
      %c253_i32 = arith.constant 253 : i32
      %209 = tpu.dynamic_rotate %17 by %c253_i32 dim 1 : vector<1x256xf32>, i32 -> vector<1x256xf32>
      %c6 = arith.constant 6 : index
      %c0_26 = arith.constant 0 : index
      %210 = vector.load %arg4[%c6, %c0_26] : memref<7x256xf32, #tpu.memory_space<vmem>>, vector<1x256xf32>
      %211 = vector.shape_cast %210 : vector<1x256xf32> to vector<256xf32>
      %212 = vector.shape_cast %211 : vector<256xf32> to vector<1x256xf32>
      %213 = arith.mulf %209, %212 : vector<1x256xf32>
      %c6_27 = arith.constant 6 : index
      %214 = memref.load %arg3[%c6_27] : memref<98xf32, #tpu.memory_space<smem>>
      %215 = vector.broadcast %214 : f32 to vector<1x256xf32>
      %216 = arith.mulf %215, %213 : vector<1x256xf32>
      %217 = arith.addf %184, %216 : vector<1x256xf32>
      %c13 = arith.constant 13 : index
      %218 = memref.load %arg3[%c13] : memref<98xf32, #tpu.memory_space<smem>>
      %219 = vector.broadcast %218 : f32 to vector<1x256xf32>
      %220 = arith.mulf %219, %213 : vector<1x256xf32>
      %221 = arith.addf %188, %220 : vector<1x256xf32>
      %c20 = arith.constant 20 : index
      %222 = memref.load %arg3[%c20] : memref<98xf32, #tpu.memory_space<smem>>
      %223 = vector.broadcast %222 : f32 to vector<1x256xf32>
      %224 = arith.mulf %223, %213 : vector<1x256xf32>
      %225 = arith.addf %192, %224 : vector<1x256xf32>
      %c27 = arith.constant 27 : index
      %226 = memref.load %arg3[%c27] : memref<98xf32, #tpu.memory_space<smem>>
      %227 = vector.broadcast %226 : f32 to vector<1x256xf32>
      %228 = arith.mulf %227, %213 : vector<1x256xf32>
      %229 = arith.addf %196, %228 : vector<1x256xf32>
      %c34 = arith.constant 34 : index
      %230 = memref.load %arg3[%c34] : memref<98xf32, #tpu.memory_space<smem>>
      %231 = vector.broadcast %230 : f32 to vector<1x256xf32>
      %232 = arith.mulf %231, %213 : vector<1x256xf32>
      %233 = arith.addf %200, %232 : vector<1x256xf32>
      %c41 = arith.constant 41 : index
      %234 = memref.load %arg3[%c41] : memref<98xf32, #tpu.memory_space<smem>>
      %235 = vector.broadcast %234 : f32 to vector<1x256xf32>
      %236 = arith.mulf %235, %213 : vector<1x256xf32>
      %237 = arith.addf %204, %236 : vector<1x256xf32>
      %c48 = arith.constant 48 : index
      %238 = memref.load %arg3[%c48] : memref<98xf32, #tpu.memory_space<smem>>
      %239 = vector.broadcast %238 : f32 to vector<1x256xf32>
      %240 = arith.mulf %239, %213 : vector<1x256xf32>
      %241 = arith.addf %208, %240 : vector<1x256xf32>
      %c3_i32_28 = arith.constant 3 : i32
      %242 = tpu.dynamic_rotate %18 by %c3_i32_28 dim 1 : vector<1x256xf32>, i32 -> vector<1x256xf32>
      %c0_29 = arith.constant 0 : index
      %c0_30 = arith.constant 0 : index
      %243 = vector.load %arg4[%c0_29, %c0_30] : memref<7x256xf32, #tpu.memory_space<vmem>>, vector<1x256xf32>
      %244 = vector.shape_cast %243 : vector<1x256xf32> to vector<256xf32>
      %245 = vector.shape_cast %244 : vector<256xf32> to vector<1x256xf32>
      %246 = arith.mulf %242, %245 : vector<1x256xf32>
      %c49 = arith.constant 49 : index
      %247 = memref.load %arg3[%c49] : memref<98xf32, #tpu.memory_space<smem>>
      %248 = vector.broadcast %247 : f32 to vector<1x256xf32>
      %249 = arith.mulf %248, %246 : vector<1x256xf32>
      %250 = arith.addf %217, %249 : vector<1x256xf32>
      %c56 = arith.constant 56 : index
      %251 = memref.load %arg3[%c56] : memref<98xf32, #tpu.memory_space<smem>>
      %252 = vector.broadcast %251 : f32 to vector<1x256xf32>
      %253 = arith.mulf %252, %246 : vector<1x256xf32>
      %254 = arith.addf %221, %253 : vector<1x256xf32>
      %c63 = arith.constant 63 : index
      %255 = memref.load %arg3[%c63] : memref<98xf32, #tpu.memory_space<smem>>
      %256 = vector.broadcast %255 : f32 to vector<1x256xf32>
      %257 = arith.mulf %256, %246 : vector<1x256xf32>
      %258 = arith.addf %225, %257 : vector<1x256xf32>
      %c70 = arith.constant 70 : index
      %259 = memref.load %arg3[%c70] : memref<98xf32, #tpu.memory_space<smem>>
      %260 = vector.broadcast %259 : f32 to vector<1x256xf32>
      %261 = arith.mulf %260, %246 : vector<1x256xf32>
      %262 = arith.addf %229, %261 : vector<1x256xf32>
      %c77 = arith.constant 77 : index
      %263 = memref.load %arg3[%c77] : memref<98xf32, #tpu.memory_space<smem>>
      %264 = vector.broadcast %263 : f32 to vector<1x256xf32>
      %265 = arith.mulf %264, %246 : vector<1x256xf32>
      %266 = arith.addf %233, %265 : vector<1x256xf32>
      %c84 = arith.constant 84 : index
      %267 = memref.load %arg3[%c84] : memref<98xf32, #tpu.memory_space<smem>>
      %268 = vector.broadcast %267 : f32 to vector<1x256xf32>
      %269 = arith.mulf %268, %246 : vector<1x256xf32>
      %270 = arith.addf %237, %269 : vector<1x256xf32>
      %c91 = arith.constant 91 : index
      %271 = memref.load %arg3[%c91] : memref<98xf32, #tpu.memory_space<smem>>
      %272 = vector.broadcast %271 : f32 to vector<1x256xf32>
      %273 = arith.mulf %272, %246 : vector<1x256xf32>
      %274 = arith.addf %241, %273 : vector<1x256xf32>
      %c2_i32_31 = arith.constant 2 : i32
      %275 = tpu.dynamic_rotate %18 by %c2_i32_31 dim 1 : vector<1x256xf32>, i32 -> vector<1x256xf32>
      %c1_32 = arith.constant 1 : index
      %c0_33 = arith.constant 0 : index
      %276 = vector.load %arg4[%c1_32, %c0_33] : memref<7x256xf32, #tpu.memory_space<vmem>>, vector<1x256xf32>
      %277 = vector.shape_cast %276 : vector<1x256xf32> to vector<256xf32>
      %278 = vector.shape_cast %277 : vector<256xf32> to vector<1x256xf32>
      %279 = arith.mulf %275, %278 : vector<1x256xf32>
      %c50 = arith.constant 50 : index
      %280 = memref.load %arg3[%c50] : memref<98xf32, #tpu.memory_space<smem>>
      %281 = vector.broadcast %280 : f32 to vector<1x256xf32>
      %282 = arith.mulf %281, %279 : vector<1x256xf32>
      %283 = arith.addf %250, %282 : vector<1x256xf32>
      %c57 = arith.constant 57 : index
      %284 = memref.load %arg3[%c57] : memref<98xf32, #tpu.memory_space<smem>>
      %285 = vector.broadcast %284 : f32 to vector<1x256xf32>
      %286 = arith.mulf %285, %279 : vector<1x256xf32>
      %287 = arith.addf %254, %286 : vector<1x256xf32>
      %c64 = arith.constant 64 : index
      %288 = memref.load %arg3[%c64] : memref<98xf32, #tpu.memory_space<smem>>
      %289 = vector.broadcast %288 : f32 to vector<1x256xf32>
      %290 = arith.mulf %289, %279 : vector<1x256xf32>
      %291 = arith.addf %258, %290 : vector<1x256xf32>
      %c71 = arith.constant 71 : index
      %292 = memref.load %arg3[%c71] : memref<98xf32, #tpu.memory_space<smem>>
      %293 = vector.broadcast %292 : f32 to vector<1x256xf32>
      %294 = arith.mulf %293, %279 : vector<1x256xf32>
      %295 = arith.addf %262, %294 : vector<1x256xf32>
      %c78 = arith.constant 78 : index
      %296 = memref.load %arg3[%c78] : memref<98xf32, #tpu.memory_space<smem>>
      %297 = vector.broadcast %296 : f32 to vector<1x256xf32>
      %298 = arith.mulf %297, %279 : vector<1x256xf32>
      %299 = arith.addf %266, %298 : vector<1x256xf32>
      %c85 = arith.constant 85 : index
      %300 = memref.load %arg3[%c85] : memref<98xf32, #tpu.memory_space<smem>>
      %301 = vector.broadcast %300 : f32 to vector<1x256xf32>
      %302 = arith.mulf %301, %279 : vector<1x256xf32>
      %303 = arith.addf %270, %302 : vector<1x256xf32>
      %c92 = arith.constant 92 : index
      %304 = memref.load %arg3[%c92] : memref<98xf32, #tpu.memory_space<smem>>
      %305 = vector.broadcast %304 : f32 to vector<1x256xf32>
      %306 = arith.mulf %305, %279 : vector<1x256xf32>
      %307 = arith.addf %274, %306 : vector<1x256xf32>
      %c1_i32_34 = arith.constant 1 : i32
      %308 = tpu.dynamic_rotate %18 by %c1_i32_34 dim 1 : vector<1x256xf32>, i32 -> vector<1x256xf32>
      %c2_35 = arith.constant 2 : index
      %c0_36 = arith.constant 0 : index
      %309 = vector.load %arg4[%c2_35, %c0_36] : memref<7x256xf32, #tpu.memory_space<vmem>>, vector<1x256xf32>
      %310 = vector.shape_cast %309 : vector<1x256xf32> to vector<256xf32>
      %311 = vector.shape_cast %310 : vector<256xf32> to vector<1x256xf32>
      %312 = arith.mulf %308, %311 : vector<1x256xf32>
      %c51 = arith.constant 51 : index
      %313 = memref.load %arg3[%c51] : memref<98xf32, #tpu.memory_space<smem>>
      %314 = vector.broadcast %313 : f32 to vector<1x256xf32>
      %315 = arith.mulf %314, %312 : vector<1x256xf32>
      %316 = arith.addf %283, %315 : vector<1x256xf32>
      %c58 = arith.constant 58 : index
      %317 = memref.load %arg3[%c58] : memref<98xf32, #tpu.memory_space<smem>>
      %318 = vector.broadcast %317 : f32 to vector<1x256xf32>
      %319 = arith.mulf %318, %312 : vector<1x256xf32>
      %320 = arith.addf %287, %319 : vector<1x256xf32>
      %c65 = arith.constant 65 : index
      %321 = memref.load %arg3[%c65] : memref<98xf32, #tpu.memory_space<smem>>
      %322 = vector.broadcast %321 : f32 to vector<1x256xf32>
      %323 = arith.mulf %322, %312 : vector<1x256xf32>
      %324 = arith.addf %291, %323 : vector<1x256xf32>
      %c72 = arith.constant 72 : index
      %325 = memref.load %arg3[%c72] : memref<98xf32, #tpu.memory_space<smem>>
      %326 = vector.broadcast %325 : f32 to vector<1x256xf32>
      %327 = arith.mulf %326, %312 : vector<1x256xf32>
      %328 = arith.addf %295, %327 : vector<1x256xf32>
      %c79 = arith.constant 79 : index
      %329 = memref.load %arg3[%c79] : memref<98xf32, #tpu.memory_space<smem>>
      %330 = vector.broadcast %329 : f32 to vector<1x256xf32>
      %331 = arith.mulf %330, %312 : vector<1x256xf32>
      %332 = arith.addf %299, %331 : vector<1x256xf32>
      %c86 = arith.constant 86 : index
      %333 = memref.load %arg3[%c86] : memref<98xf32, #tpu.memory_space<smem>>
      %334 = vector.broadcast %333 : f32 to vector<1x256xf32>
      %335 = arith.mulf %334, %312 : vector<1x256xf32>
      %336 = arith.addf %303, %335 : vector<1x256xf32>
      %c93 = arith.constant 93 : index
      %337 = memref.load %arg3[%c93] : memref<98xf32, #tpu.memory_space<smem>>
      %338 = vector.broadcast %337 : f32 to vector<1x256xf32>
      %339 = arith.mulf %338, %312 : vector<1x256xf32>
      %340 = arith.addf %307, %339 : vector<1x256xf32>
      %c3_37 = arith.constant 3 : index
      %c0_38 = arith.constant 0 : index
      %341 = vector.load %arg4[%c3_37, %c0_38] : memref<7x256xf32, #tpu.memory_space<vmem>>, vector<1x256xf32>
      %342 = vector.shape_cast %341 : vector<1x256xf32> to vector<256xf32>
      %343 = vector.shape_cast %342 : vector<256xf32> to vector<1x256xf32>
      %344 = arith.mulf %18, %343 : vector<1x256xf32>
      %c52 = arith.constant 52 : index
      %345 = memref.load %arg3[%c52] : memref<98xf32, #tpu.memory_space<smem>>
      %346 = vector.broadcast %345 : f32 to vector<1x256xf32>
      %347 = arith.mulf %346, %344 : vector<1x256xf32>
      %348 = arith.addf %316, %347 : vector<1x256xf32>
      %c59 = arith.constant 59 : index
      %349 = memref.load %arg3[%c59] : memref<98xf32, #tpu.memory_space<smem>>
      %350 = vector.broadcast %349 : f32 to vector<1x256xf32>
      %351 = arith.mulf %350, %344 : vector<1x256xf32>
      %352 = arith.addf %320, %351 : vector<1x256xf32>
      %c66 = arith.constant 66 : index
      %353 = memref.load %arg3[%c66] : memref<98xf32, #tpu.memory_space<smem>>
      %354 = vector.broadcast %353 : f32 to vector<1x256xf32>
      %355 = arith.mulf %354, %344 : vector<1x256xf32>
      %356 = arith.addf %324, %355 : vector<1x256xf32>
      %c73 = arith.constant 73 : index
      %357 = memref.load %arg3[%c73] : memref<98xf32, #tpu.memory_space<smem>>
      %358 = vector.broadcast %357 : f32 to vector<1x256xf32>
      %359 = arith.mulf %358, %344 : vector<1x256xf32>
      %360 = arith.addf %328, %359 : vector<1x256xf32>
      %c80 = arith.constant 80 : index
      %361 = memref.load %arg3[%c80] : memref<98xf32, #tpu.memory_space<smem>>
      %362 = vector.broadcast %361 : f32 to vector<1x256xf32>
      %363 = arith.mulf %362, %344 : vector<1x256xf32>
      %364 = arith.addf %332, %363 : vector<1x256xf32>
      %c87 = arith.constant 87 : index
      %365 = memref.load %arg3[%c87] : memref<98xf32, #tpu.memory_space<smem>>
      %366 = vector.broadcast %365 : f32 to vector<1x256xf32>
      %367 = arith.mulf %366, %344 : vector<1x256xf32>
      %368 = arith.addf %336, %367 : vector<1x256xf32>
      %c94 = arith.constant 94 : index
      %369 = memref.load %arg3[%c94] : memref<98xf32, #tpu.memory_space<smem>>
      %370 = vector.broadcast %369 : f32 to vector<1x256xf32>
      %371 = arith.mulf %370, %344 : vector<1x256xf32>
      %372 = arith.addf %340, %371 : vector<1x256xf32>
      %c255_i32_39 = arith.constant 255 : i32
      %373 = tpu.dynamic_rotate %18 by %c255_i32_39 dim 1 : vector<1x256xf32>, i32 -> vector<1x256xf32>
      %c4_40 = arith.constant 4 : index
      %c0_41 = arith.constant 0 : index
      %374 = vector.load %arg4[%c4_40, %c0_41] : memref<7x256xf32, #tpu.memory_space<vmem>>, vector<1x256xf32>
      %375 = vector.shape_cast %374 : vector<1x256xf32> to vector<256xf32>
      %376 = vector.shape_cast %375 : vector<256xf32> to vector<1x256xf32>
      %377 = arith.mulf %373, %376 : vector<1x256xf32>
      %c53 = arith.constant 53 : index
      %378 = memref.load %arg3[%c53] : memref<98xf32, #tpu.memory_space<smem>>
      %379 = vector.broadcast %378 : f32 to vector<1x256xf32>
      %380 = arith.mulf %379, %377 : vector<1x256xf32>
      %381 = arith.addf %348, %380 : vector<1x256xf32>
      %c60 = arith.constant 60 : index
      %382 = memref.load %arg3[%c60] : memref<98xf32, #tpu.memory_space<smem>>
      %383 = vector.broadcast %382 : f32 to vector<1x256xf32>
      %384 = arith.mulf %383, %377 : vector<1x256xf32>
      %385 = arith.addf %352, %384 : vector<1x256xf32>
      %c67 = arith.constant 67 : index
      %386 = memref.load %arg3[%c67] : memref<98xf32, #tpu.memory_space<smem>>
      %387 = vector.broadcast %386 : f32 to vector<1x256xf32>
      %388 = arith.mulf %387, %377 : vector<1x256xf32>
      %389 = arith.addf %356, %388 : vector<1x256xf32>
      %c74 = arith.constant 74 : index
      %390 = memref.load %arg3[%c74] : memref<98xf32, #tpu.memory_space<smem>>
      %391 = vector.broadcast %390 : f32 to vector<1x256xf32>
      %392 = arith.mulf %391, %377 : vector<1x256xf32>
      %393 = arith.addf %360, %392 : vector<1x256xf32>
      %c81 = arith.constant 81 : index
      %394 = memref.load %arg3[%c81] : memref<98xf32, #tpu.memory_space<smem>>
      %395 = vector.broadcast %394 : f32 to vector<1x256xf32>
      %396 = arith.mulf %395, %377 : vector<1x256xf32>
      %397 = arith.addf %364, %396 : vector<1x256xf32>
      %c88 = arith.constant 88 : index
      %398 = memref.load %arg3[%c88] : memref<98xf32, #tpu.memory_space<smem>>
      %399 = vector.broadcast %398 : f32 to vector<1x256xf32>
      %400 = arith.mulf %399, %377 : vector<1x256xf32>
      %401 = arith.addf %368, %400 : vector<1x256xf32>
      %c95 = arith.constant 95 : index
      %402 = memref.load %arg3[%c95] : memref<98xf32, #tpu.memory_space<smem>>
      %403 = vector.broadcast %402 : f32 to vector<1x256xf32>
      %404 = arith.mulf %403, %377 : vector<1x256xf32>
      %405 = arith.addf %372, %404 : vector<1x256xf32>
      %c254_i32_42 = arith.constant 254 : i32
      %406 = tpu.dynamic_rotate %18 by %c254_i32_42 dim 1 : vector<1x256xf32>, i32 -> vector<1x256xf32>
      %c5_43 = arith.constant 5 : index
      %c0_44 = arith.constant 0 : index
      %407 = vector.load %arg4[%c5_43, %c0_44] : memref<7x256xf32, #tpu.memory_space<vmem>>, vector<1x256xf32>
      %408 = vector.shape_cast %407 : vector<1x256xf32> to vector<256xf32>
      %409 = vector.shape_cast %408 : vector<256xf32> to vector<1x256xf32>
      %410 = arith.mulf %406, %409 : vector<1x256xf32>
      %c54 = arith.constant 54 : index
      %411 = memref.load %arg3[%c54] : memref<98xf32, #tpu.memory_space<smem>>
      %412 = vector.broadcast %411 : f32 to vector<1x256xf32>
      %413 = arith.mulf %412, %410 : vector<1x256xf32>
      %414 = arith.addf %381, %413 : vector<1x256xf32>
      %c61 = arith.constant 61 : index
      %415 = memref.load %arg3[%c61] : memref<98xf32, #tpu.memory_space<smem>>
      %416 = vector.broadcast %415 : f32 to vector<1x256xf32>
      %417 = arith.mulf %416, %410 : vector<1x256xf32>
      %418 = arith.addf %385, %417 : vector<1x256xf32>
      %c68 = arith.constant 68 : index
      %419 = memref.load %arg3[%c68] : memref<98xf32, #tpu.memory_space<smem>>
      %420 = vector.broadcast %419 : f32 to vector<1x256xf32>
      %421 = arith.mulf %420, %410 : vector<1x256xf32>
      %422 = arith.addf %389, %421 : vector<1x256xf32>
      %c75 = arith.constant 75 : index
      %423 = memref.load %arg3[%c75] : memref<98xf32, #tpu.memory_space<smem>>
      %424 = vector.broadcast %423 : f32 to vector<1x256xf32>
      %425 = arith.mulf %424, %410 : vector<1x256xf32>
      %426 = arith.addf %393, %425 : vector<1x256xf32>
      %c82 = arith.constant 82 : index
      %427 = memref.load %arg3[%c82] : memref<98xf32, #tpu.memory_space<smem>>
      %428 = vector.broadcast %427 : f32 to vector<1x256xf32>
      %429 = arith.mulf %428, %410 : vector<1x256xf32>
      %430 = arith.addf %397, %429 : vector<1x256xf32>
      %c89 = arith.constant 89 : index
      %431 = memref.load %arg3[%c89] : memref<98xf32, #tpu.memory_space<smem>>
      %432 = vector.broadcast %431 : f32 to vector<1x256xf32>
      %433 = arith.mulf %432, %410 : vector<1x256xf32>
      %434 = arith.addf %401, %433 : vector<1x256xf32>
      %c96 = arith.constant 96 : index
      %435 = memref.load %arg3[%c96] : memref<98xf32, #tpu.memory_space<smem>>
      %436 = vector.broadcast %435 : f32 to vector<1x256xf32>
      %437 = arith.mulf %436, %410 : vector<1x256xf32>
      %438 = arith.addf %405, %437 : vector<1x256xf32>
      %c253_i32_45 = arith.constant 253 : i32
      %439 = tpu.dynamic_rotate %18 by %c253_i32_45 dim 1 : vector<1x256xf32>, i32 -> vector<1x256xf32>
      %c6_46 = arith.constant 6 : index
      %c0_47 = arith.constant 0 : index
      %440 = vector.load %arg4[%c6_46, %c0_47] : memref<7x256xf32, #tpu.memory_space<vmem>>, vector<1x256xf32>
      %441 = vector.shape_cast %440 : vector<1x256xf32> to vector<256xf32>
      %442 = vector.shape_cast %441 : vector<256xf32> to vector<1x256xf32>
      %443 = arith.mulf %439, %442 : vector<1x256xf32>
      %c55 = arith.constant 55 : index
      %444 = memref.load %arg3[%c55] : memref<98xf32, #tpu.memory_space<smem>>
      %445 = vector.broadcast %444 : f32 to vector<1x256xf32>
      %446 = arith.mulf %445, %443 : vector<1x256xf32>
      %447 = arith.addf %414, %446 : vector<1x256xf32>
      %c62 = arith.constant 62 : index
      %448 = memref.load %arg3[%c62] : memref<98xf32, #tpu.memory_space<smem>>
      %449 = vector.broadcast %448 : f32 to vector<1x256xf32>
      %450 = arith.mulf %449, %443 : vector<1x256xf32>
      %451 = arith.addf %418, %450 : vector<1x256xf32>
      %c69 = arith.constant 69 : index
      %452 = memref.load %arg3[%c69] : memref<98xf32, #tpu.memory_space<smem>>
      %453 = vector.broadcast %452 : f32 to vector<1x256xf32>
      %454 = arith.mulf %453, %443 : vector<1x256xf32>
      %455 = arith.addf %422, %454 : vector<1x256xf32>
      %c76 = arith.constant 76 : index
      %456 = memref.load %arg3[%c76] : memref<98xf32, #tpu.memory_space<smem>>
      %457 = vector.broadcast %456 : f32 to vector<1x256xf32>
      %458 = arith.mulf %457, %443 : vector<1x256xf32>
      %459 = arith.addf %426, %458 : vector<1x256xf32>
      %c83 = arith.constant 83 : index
      %460 = memref.load %arg3[%c83] : memref<98xf32, #tpu.memory_space<smem>>
      %461 = vector.broadcast %460 : f32 to vector<1x256xf32>
      %462 = arith.mulf %461, %443 : vector<1x256xf32>
      %463 = arith.addf %430, %462 : vector<1x256xf32>
      %c90 = arith.constant 90 : index
      %464 = memref.load %arg3[%c90] : memref<98xf32, #tpu.memory_space<smem>>
      %465 = vector.broadcast %464 : f32 to vector<1x256xf32>
      %466 = arith.mulf %465, %443 : vector<1x256xf32>
      %467 = arith.addf %434, %466 : vector<1x256xf32>
      %c97 = arith.constant 97 : index
      %468 = memref.load %arg3[%c97] : memref<98xf32, #tpu.memory_space<smem>>
      %469 = vector.broadcast %468 : f32 to vector<1x256xf32>
      %470 = arith.mulf %469, %443 : vector<1x256xf32>
      %471 = arith.addf %438, %470 : vector<1x256xf32>
      %c48_i32 = arith.constant 48 : i32
      %472 = tpu.dynamic_rotate %447 by %c48_i32 dim 1 : vector<1x256xf32>, i32 -> vector<1x256xf32>
      %c0_48 = arith.constant 0 : index
      %c0_49 = arith.constant 0 : index
      %473 = vector.load %arg5[%c0_48, %c0_49] : memref<7x256xf32, #tpu.memory_space<vmem>>, vector<1x256xf32>
      %474 = vector.shape_cast %473 : vector<1x256xf32> to vector<256xf32>
      %475 = vector.shape_cast %474 : vector<256xf32> to vector<1x256xf32>
      %476 = arith.mulf %472, %475 : vector<1x256xf32>
      %c32_i32 = arith.constant 32 : i32
      %477 = tpu.dynamic_rotate %451 by %c32_i32 dim 1 : vector<1x256xf32>, i32 -> vector<1x256xf32>
      %c1_50 = arith.constant 1 : index
      %c0_51 = arith.constant 0 : index
      %478 = vector.load %arg5[%c1_50, %c0_51] : memref<7x256xf32, #tpu.memory_space<vmem>>, vector<1x256xf32>
      %479 = vector.shape_cast %478 : vector<1x256xf32> to vector<256xf32>
      %480 = vector.shape_cast %479 : vector<256xf32> to vector<1x256xf32>
      %481 = arith.mulf %477, %480 : vector<1x256xf32>
      %482 = arith.addf %476, %481 : vector<1x256xf32>
      %c16_i32 = arith.constant 16 : i32
      %483 = tpu.dynamic_rotate %455 by %c16_i32 dim 1 : vector<1x256xf32>, i32 -> vector<1x256xf32>
      %c2_52 = arith.constant 2 : index
      %c0_53 = arith.constant 0 : index
      %484 = vector.load %arg5[%c2_52, %c0_53] : memref<7x256xf32, #tpu.memory_space<vmem>>, vector<1x256xf32>
      %485 = vector.shape_cast %484 : vector<1x256xf32> to vector<256xf32>
      %486 = vector.shape_cast %485 : vector<256xf32> to vector<1x256xf32>
      %487 = arith.mulf %483, %486 : vector<1x256xf32>
      %488 = arith.addf %482, %487 : vector<1x256xf32>
      %c3_54 = arith.constant 3 : index
      %c0_55 = arith.constant 0 : index
      %489 = vector.load %arg5[%c3_54, %c0_55] : memref<7x256xf32, #tpu.memory_space<vmem>>, vector<1x256xf32>
      %490 = vector.shape_cast %489 : vector<1x256xf32> to vector<256xf32>
      %491 = vector.shape_cast %490 : vector<256xf32> to vector<1x256xf32>
      %492 = arith.mulf %459, %491 : vector<1x256xf32>
      %493 = arith.addf %488, %492 : vector<1x256xf32>
      %c240_i32 = arith.constant 240 : i32
      %494 = tpu.dynamic_rotate %463 by %c240_i32 dim 1 : vector<1x256xf32>, i32 -> vector<1x256xf32>
      %c4_56 = arith.constant 4 : index
      %c0_57 = arith.constant 0 : index
      %495 = vector.load %arg5[%c4_56, %c0_57] : memref<7x256xf32, #tpu.memory_space<vmem>>, vector<1x256xf32>
      %496 = vector.shape_cast %495 : vector<1x256xf32> to vector<256xf32>
      %497 = vector.shape_cast %496 : vector<256xf32> to vector<1x256xf32>
      %498 = arith.mulf %494, %497 : vector<1x256xf32>
      %499 = arith.addf %493, %498 : vector<1x256xf32>
      %c224_i32 = arith.constant 224 : i32
      %500 = tpu.dynamic_rotate %467 by %c224_i32 dim 1 : vector<1x256xf32>, i32 -> vector<1x256xf32>
      %c5_58 = arith.constant 5 : index
      %c0_59 = arith.constant 0 : index
      %501 = vector.load %arg5[%c5_58, %c0_59] : memref<7x256xf32, #tpu.memory_space<vmem>>, vector<1x256xf32>
      %502 = vector.shape_cast %501 : vector<1x256xf32> to vector<256xf32>
      %503 = vector.shape_cast %502 : vector<256xf32> to vector<1x256xf32>
      %504 = arith.mulf %500, %503 : vector<1x256xf32>
      %505 = arith.addf %499, %504 : vector<1x256xf32>
      %c208_i32 = arith.constant 208 : i32
      %506 = tpu.dynamic_rotate %471 by %c208_i32 dim 1 : vector<1x256xf32>, i32 -> vector<1x256xf32>
      %c6_60 = arith.constant 6 : index
      %c0_61 = arith.constant 0 : index
      %507 = vector.load %arg5[%c6_60, %c0_61] : memref<7x256xf32, #tpu.memory_space<vmem>>, vector<1x256xf32>
      %508 = vector.shape_cast %507 : vector<1x256xf32> to vector<256xf32>
      %509 = vector.shape_cast %508 : vector<256xf32> to vector<1x256xf32>
      %510 = arith.mulf %506, %509 : vector<1x256xf32>
      %511 = arith.addf %505, %510 : vector<1x256xf32>
      %cst_62 = arith.constant 0.000000e+00 : f32
      %512 = vector.broadcast %cst_62 : f32 to vector<1x256xf32>
      %513 = arith.subf %512, %511 : vector<1x256xf32>
      %514 = math.exp %513 : vector<1x256xf32>
      %cst_63 = arith.constant 1.000000e+00 : f32
      %515 = vector.broadcast %cst_63 : f32 to vector<1x256xf32>
      %516 = arith.addf %515, %514 : vector<1x256xf32>
      %cst_64 = arith.constant 1.000000e+00 : f32
      %517 = vector.broadcast %cst_64 : f32 to vector<1x256xf32>
      %518 = arith.divf %517, %516 : vector<1x256xf32>
      %c0_65 = arith.constant 0 : index
      %c0_66 = arith.constant 0 : index
      %c0_67 = arith.constant 0 : index
      %519 = vector.load %arg6[%c0_65, %c0_66, %c0_67] : memref<1x1x256xf32, #tpu.memory_space<vmem>>, vector<1x1x256xf32>
      %520 = vector.shape_cast %519 : vector<1x1x256xf32> to vector<1x256xf32>
      %521 = vector.shape_cast %518 : vector<1x256xf32> to vector<1x1x256xf32>
      tpu.vector_store %arg6[%c0_65, %c0_66, %c0_67], %521 {strides = array<i32>} : memref<1x1x256xf32, #tpu.memory_space<vmem>>, vector<1x1x256xf32>,
    } else {
    }
    return
  }
  func.func @transform_0(%arg0: i32, %arg1: i32) -> (i32, i32, i32) {
    %c0_i32 = arith.constant 0 : i32
    %c0_i32_0 = arith.constant 0 : i32
    return %arg0, %arg1, %c0_i32 : i32, i32, i32
  }
  func.func @transform_1(%arg0: i32, %arg1: i32) -> i32 {
    %c0_i32 = arith.constant 0 : i32
    %c0_i32_0 = arith.constant 0 : i32
    return %c0_i32 : i32
  }
  func.func @transform_2(%arg0: i32, %arg1: i32) -> (i32, i32) {
    %c0_i32 = arith.constant 0 : i32
    %c0_i32_0 = arith.constant 0 : i32
    %c0_i32_1 = arith.constant 0 : i32
    return %c0_i32, %c0_i32_0 : i32, i32
  }
  func.func @transform_3(%arg0: i32, %arg1: i32) -> (i32, i32) {
    %c0_i32 = arith.constant 0 : i32
    %c0_i32_0 = arith.constant 0 : i32
    %c0_i32_1 = arith.constant 0 : i32
    return %c0_i32, %c0_i32_0 : i32, i32
  }
  func.func @transform_4(%arg0: i32, %arg1: i32) -> (i32, i32, i32) {
    %c0_i32 = arith.constant 0 : i32
    %c0_i32_0 = arith.constant 0 : i32
    %c0_i32_1 = arith.constant 0 : i32
    return %arg0, %c0_i32, %c0_i32_0 : i32, i32, i32
  }
}

</mosaic_0001>

<bundles_post_ra>
// kernel: tpu_custom_call.1
= control target key start
LH: loop header
LB: loop body
LE: loop exit
PB: predicated region body
PF: predicated region fallthrough
CT: control target
= control target key end

     0   :  { %s3613_s0 = inlined_call_operand.hbm [shape: f32[2,4,256], index: 0, kind: input, shape index: {}]   ;;  %s3614_s1 = inlined_call_operand.vmem [shape: f32[98], index: 1, kind: input, shape index: {}]   ;;  %s3615_s2 = inlined_call_operand.hbm [shape: f32[7,256], index: 2, kind: input, shape index: {}]   ;;  %s3616_s3 = inlined_call_operand.hbm [shape: f32[7,256], index: 3, kind: input, shape index: {}]   ;;  %s3617_s4 = inlined_call_operand.hbm [shape: f32[2,1,256], index: 4, kind: output, shape index: {}]  }
   0x1   :  { %3752 = sst [smem:[#allocation136_spill]] %s3613_s0 }
   0x2   :  { %3753 = sst [smem:[#allocation137_spill]] %s3614_s1 }
   0x3   :  { %3754 = sst [smem:[#allocation138_spill]] %s3615_s2 }
   0x4   :  { %3755 = sst [smem:[#allocation139_spill]] %s3616_s3 }
   0x5   :  { %3756 = sst [smem:[#allocation140_spill]] %s3617_s4 }
   0x6   :  { %9 = vsyncpa [#allocation5], 0 }
   0x7   :  { %11 = vsyncpa [#allocation5 + $0x1], 0 }
   0x8   :  { %12 = vsyncpa [#allocation7], 0 }
   0x9   :  { %13 = vsyncpa [#allocation10], 0 }
   0xa   :  { %14 = vsyncpa [#allocation6], 0 }
   0xb   :  { %16 = vsyncpa [#allocation6 + $0x1], 0  ;;  %s2108_s15 = smov 0   ;;  %s2110_s16 = smov 0  }
   0xc   :  { %s2112_s17 = smov 0   ;;  %s2114_s18 = smov 0  }
   0xd   :  { %s2116_s19 = smov 0   ;;  %s2118_s20 = smov 0  }
   0xe LB: > { %3757 = sst [smem:[#allocation17_spill]] %s2043_s15  ;;  %s1645_s21 = sadd.s32 4294967295, %s2063_s20   ;;  %s2063_s20 = sphi %s2118_s20, %s22_s20   ;;  %s2059_s19 = sphi %s2116_s19, %s4218_s19   ;;  %s2055_s18 = sphi %s2114_s18, %s4217_s18   ;;  %s2051_s17 = sphi %s2112_s17, %s4216_s17   ;;  %s2047_s16 = sphi %s2110_s16, %s4215_s16   ;;  %s2043_s15 = sphi %s2108_s15, %s4214_s15  }
   0xf   : > { %3758 = sst [smem:[#allocation18_spill]] %s2047_s16  ;;  %s1646_s22 = sadd.s32 4294967294, %s2063_s20  }
  0x10   : > { %3759 = sst [smem:[#allocation19_spill]] %s2051_s17  ;;  %p56_p0 = scmp.ne.s32.totalorder %s2047_s16, %s2043_s15 }
  0x11   : > { %3760 = sst [smem:[#allocation20_spill]] %s2055_s18  ;;  %p2142_p1 = scmp.eq.s32.totalorder %s1645_s21, 0 }
  0x12   : > { %3761 = sst [smem:[#allocation21_spill]] %s2059_s19  ;;  %p2146_p2 = scmp.eq.s32.totalorder %s1645_s21, 1 }
  0x13   : > { %3762 = sst [smem:[#allocation22_spill]] %s2063_s20  ;;  %p149_p3 = scmp.eq.s32.totalorder %s1646_s22, 1 }
  0x14   : > { %s3763_s23 = scalar_select %p2142_p1, 1, 0 }
  0x15   : > { %s3764_s24 = scalar_select %p2146_p2, 1, 0 }
  0x16   : > { %p2152_p4 = por %p2142_p1, %p56_p0  ;;  %p1647_p5 = scmp.ge.s32.totalorder %s2063_s20, 1 }
  0x17   : > { %p2157_p6 = por %p149_p3, %p56_p0  ;;  %p156_p7 = scmp.lt.s32.totalorder %s2063_s20, 3 }
  0x18   : > { %s3765_s25 = scalar_select %p2152_p4, 1, 0 }
  0x19   : > { %s3766_s26 = scalar_select %p2157_p6, 1, 0 }
  0x1a   : > { %p2162_p8 = pnand %p1647_p5, %p156_p7  ;;  %s2065_s28 = smov [#allocation9]  }
  0x1b   : > { %3767 = sst [smem:[#allocation23_spill]] %s3766_s26  ;;  %s180_s29 = sshll.u32 %s2065_s28, 4  ;;  %s181_s29 = int_to_ptr.vmem [resolvable:$true] %s180_s29 }
  0x1c   : > { %s3768_s27 = scalar_select %p2162_p8, 1, 0 }
  0x1d   : > { %p1781_p10 = pneg %p2162_p8  ;;  %s3769_s1 = sld [smem:[#allocation137_spill]] }
  0x1e   : > { %s2066_s8 = smov [#allocation11]   ;;  %s1891_s10 = scalar_lea.vmem %s181_s29, 256 }
  0x1f   : > { %p2174_p11 = pnand %p1781_p10, %p2142_p1  ;;  %s191_s9 = sshll.u32 %s2066_s8, 4  ;;  %s192_s9 = int_to_ptr.vmem [resolvable:$true] %s191_s9 }
  0x20   : > { %p1892_p13 = scmp.ne.s32.totalorder %s181_s29, %s1891_s10  ;;  %p1899_p5 = scmp.lt.s32.totalorder %s181_s29, %s181_s29 }
  0x21   : > { %p1882_p12 = pneg %p2174_p11  ;;  %p1900_p7 = scmp.lt.s32.totalorder %s1891_s10, %s1891_s10 }
  0x23   : > { %s169_s6 = sshll.u32 %s3769_s1, 4  ;;  %p1894_p0 = pnand %p1892_p13, %p1882_p12  ;;  %s170_s6 = int_to_ptr.vmem [resolvable:$true] %s169_s6 }
  0x24   : > { %p1901_p9 = por %p1900_p7, %p1899_p5 }
  0x25   : > { %p1895_p3 = pneg %p1894_p0 }
  0x27   : > { %p1902_p10 = pnand %p1901_p9, %p1895_p3 }
  0x29   : > { %1905 = shalt.err (!%p1902_p10)
}
  0x2a   : > { %s3771_s2 = sld [smem:[#allocation138_spill]]  ;;  %s1906_s13 = scalar_lea.vmem %s170_s6, 16 }
  0x2b   : > { %p1907_p6 = scmp.ne.s32.totalorder %s170_s6, %s1906_s13  ;;  %p1914_p13 = scmp.lt.s32.totalorder %s170_s6, %s170_s6 }
  0x2c   : > { %p1915_p0 = scmp.lt.s32.totalorder %s1906_s13, %s1906_s13 }
  0x2d   : > { %p1909_p1 = pnand %p1907_p6, %p1882_p12 }
  0x2e   : > { %p1916_p8 = por %p1915_p0, %p1914_p13 }
  0x2f   : > { %p1910_p4 = pneg %p1909_p1 }
  0x30   : > { %1787 = dma.hbm_to_vmem [thread:$0]  (!%p2174_p11), %s3771_s2, 256, %s181_s29, [#allocation10]  }
  0x31   : > { %p1917_p2 = pnand %p1916_p8, %p1910_p4 }
  0x33   : > { %1920 = shalt.err (!%p1917_p2)
}
  0x34   : > { %s2067_s14 = smov [#allocation8]   ;;  %s1932_s21 = scalar_lea.vmem %s192_s9, 256 }
  0x35   : > { %1784 = dma.vmem_to_smem (!%p2174_p11), %s170_s6, 16, %s2067_s14, [#allocation7]  }
  0x36   : > { %p1933_p9 = scmp.ne.s32.totalorder %s192_s9, %s1932_s21  ;;  %p1940_p7 = scmp.lt.s32.totalorder %s192_s9, %s192_s9 }
  0x37   : > { %p1941_p6 = scmp.lt.s32.totalorder %s1932_s21, %s1932_s21 }
  0x38   : > { %p1935_p3 = pnand %p1933_p9, %p1882_p12 }
  0x39   : > { %p1942_p1 = por %p1941_p6, %p1940_p7 }
  0x3a   : > { %p1936_p5 = pneg %p1935_p3 }
  0x3c   : > { %p1943_p10 = pnand %p1942_p1, %p1936_p5 }
  0x3e   : > { %1946 = shalt.err (!%p1943_p10)
}
  0x3f   : > { %s3772_s3 = sld [smem:[#allocation139_spill]]  ;;  %s43_s29 = sadd.s32 1, %s2051_s17 }
  0x40   : > { %s34_s30 = sadd.s32 1, %s2059_s19  ;;  %p50_p2 = scmp.ne.s32.totalorder %s2051_s17, %s2047_s16 }
  0x41   : > { %p36_p4 = scmp.ge.s32.totalorder %s34_s30, 2  ;;  %p51_p8 = scmp.eq.s32.totalorder %s2063_s20, 0 }
  0x42   : > { %p3773_p12 = scmp.ne.s32.totalorder %s3764_s24, 0  ;;  %p1802_p0 = scmp.lt.s32.totalorder %s2063_s20, 2 }
  0x43   : > { %s4220_s30 = smov (%p36_p4, %s34_s30), 0  ;;  %p52_p9 = por %p51_p8, %p50_p2 }
  0x44   : > { %p2208_p13 = por %p3773_p12, %p50_p2  ;;  %3776 = sst [smem:[#allocation25_spill]] %s4220_s30 }
  0x45   : > { %1790 = dma.hbm_to_vmem [thread:$0]  (!%p2174_p11), %s3772_s3, 256, %s192_s9, [#allocation10]  }
  0x46   : > { %s3774_s5 = scalar_select %p2208_p13, 1, 0 }
  0x47   : > { %s202_s6 = sand.u32 1, %s2051_s17   ;;  %s38_s7 = ssub.s32 %s2059_s19, %s4220_s30 }
  0x48   : > { %3775 = sst [smem:[#allocation24_spill]] %s3774_s5  ;;  %p41_p3 = scmp.eq.s32.totalorder %s38_s7, 0 }
  0x49   : > { %s1652_s8 = sshll.u32 %s202_s6, 3  ;;  %s1763_s9 = sshll.u32 %s2059_s19, 7 }
  0x4a   : > { %s2220_s10 = scalar_select %p41_p3, %s2051_s17, %s43_s29  }
  0x4b   : > { %s3778_s0 = sld [smem:[#allocation136_spill]]  ;;  %s206_s13 = scalar_lea.vmem [#allocation4], %s1652_s8 }
  0x4c   : > { %3777 = sst [smem:[#allocation26_spill]] %s2220_s10  ;;  %s216_s14 = sshll.u32 %s206_s13, 4  ;;  %s217_s14 = int_to_ptr.vmem [resolvable:$true] %s216_s14 }
  0x4d   : > { %p2227_p11 = pnand %p1802_p0, %p52_p9  ;;  %s203_s22 = scalar_lea.sflag [#allocation5], %s202_s6 }
  0x4e   : > { %s1960_s28 = scalar_lea.vmem %s217_s14, 128  ;;  %s2068_s29 = smov [#allocation4]  }
  0x4f   : > { %p1949_p5 = pneg %p2227_p11  ;;  %p1961_p7 = scmp.ne.s32.totalorder %s217_s14, %s1960_s28 }
  0x50   : > { %s1965_s7 = sshll.u32 %s2068_s29, 4  ;;  %s1966_s7 = int_to_ptr.vmem [resolvable:$false] %s1965_s7 }
  0x51   : > { %s214_s24 = scalar_lea.hbm %s3778_s0, %s1763_s9  ;;  %p1963_p6 = pnand %p1961_p7, %p1949_p5 }
  0x52   : > { %s1967_s9 = scalar_lea.vmem %s1966_s7, 256  ;;  %p1968_p10 = scmp.lt.s32.totalorder %s217_s14, %s1966_s7 }
  0x53   : > { %p1964_p1 = pneg %p1963_p6  ;;  %p1969_p2 = scmp.lt.s32.totalorder %s1967_s9, %s1960_s28 }
  0x55   : > { %p1970_p4 = por %p1969_p2, %p1968_p10 }
  0x57   : > { %p1971_p8 = pnand %p1970_p4, %p1964_p1 }
  0x59   : > { %1974 = shalt.err (!%p1971_p8)
}
  0x5a   : > { %1794 = dma.hbm_to_vmem [thread:$0]  (!%p2227_p11), %s214_s24, 128, %s217_s14, %s203_s22  }
  0x5b   : > { %p3780_p12 = scmp.ne.s32.totalorder %s3768_s27, 0 }
  0x5d   : > { %225 = sbr.rel (%p3780_p12) target bundleno = 601 (0x259), region = 36 }
  0x62   : > { %s2238_s6 = sand.u32 1, %s2047_s16   ;;  %p3782_p0 = scmp.ne.s32.totalorder %s3765_s25, 0 }
  0x63   : > { %3781 = sst [smem:[#allocation27_spill]] %s2238_s6  ;;  %s1656_s8 = sshll.u32 %s2238_s6, 3 }
  0x64   : > { %s228_s11 = scalar_lea.sflag [#allocation5], %s2238_s6  ;;  %s231_s12 = scalar_lea.vmem [#allocation4], %s1656_s8 }
  0x65   : > { %2026 = dma.done.wait (%p3782_p0), %s228_s11, 128  }
  0x66   : > { %2028 = vsyncadd (%p3782_p0), %s228_s11, 4294967168  ;;  %p3783_p9 = scmp.ne.s32.totalorder %s3763_s23, 0 }
  0x68   : > { %2030 = dma.done.wait (%p3783_p9), [#allocation7], 16  }
  0x69   : > { %2032 = vsyncadd (%p3783_p9), [#allocation7], 4294967280 }
  0x6a   : > { %2034 = dma.done.wait (%p3783_p9), [#allocation10], 512  }
  0x6b   : > { %2036 = vsyncadd (%p3783_p9), [#allocation10], 4294966784 }
  0x6c   : > { %248 = sfence }
  0x6d   : > { %v269_v0 = vld [vmem:[%s231_s12] sm:$0xff]  ;;  %vm273_vm0 = vcmask 1043456   ;;  %v2069_v14 = vmov 1966171168   ;;  %v312_v16 = vlaneseq  ;;  %v3785_v39 = vmov 0  ;;  %s2070_s23 = smov 3  }
  0x6e   : > { %v271_v1 = vcombine.high %v269_v0, %v269_v0  ;;  %v288_v2 = vsel %vm273_vm0, %v269_v0, -inf  ;;  %v274_v3 = vsel %vm273_vm0, %v269_v0, 0.0  ;;  %v310_v15 = vunpack.c.l.s4 %v2069_v14  ;;  %s2071_s25 = smov 2   ;;  %s2072_s27 = smov 1  }
  0x6f   : > { %v289_v4 = vrot.slane %v288_v2, 4  ;;  %v275_v6 = vrot.slane %v274_v3, 4  ;;  %v313_v26 = vshrl.u32 %v312_v16, 7  ;;  %vm2259_vm1 = vcmp.lt.s32.totalorder %v312_v16, 256  ;;  %s2073_s24 = smov 127   ;;  %s2286_s13 = sld [smem:[#allocation8 + $0x1]] }
  0x70   : > { %v295_v5 = vsel %vm273_vm0, %v271_v1, -inf  ;;  %v281_v7 = vsel %vm273_vm0, %v271_v1, 0.0  ;;  %v311_v25 = vunpack.c.0.s8 %v310_v15  ;;  %v3786_v39 = vsel %vm2259_vm1, 4294967295, %v3785_v39  ;;  %s2288_s14 = sld [smem:[#allocation8 + $0x8]]  ;;  %s2074_s21 = smov 126  }
  0x71   : > { %v290_v8 = vmax.f32 %v288_v2, %v289_v4  ;;  %v296_v9 = vrot.slane %v295_v5, 4  ;;  %v276_v10 = vadd.f32 %v275_v6, %v274_v3  ;;  %v282_v11 = vrot.slane %v281_v7, 4  ;;  %3787 = vst [vmem:[#allocation29_spill] sm:$0xff] %v3786_v39  ;;  %s2290_s22 = sld [smem:[#allocation8 + $0xf]]  ;;  %s2075_s9 = smov 125  }
  0x72   : > { %v2255_v34 = vsub.s32 %v311_v25, %v313_v26  ;;  %v2270_v43 = vsub.s32 0, %v313_v26  ;;  %v2272_v44 = vsub.s32 1, %v313_v26  ;;  %s2292_s28 = sld [smem:[#allocation8 + $0x16]]  ;;  %v424_v52 = vld [vmem:[#allocation9] ss:$8 sm:$0x3] }
  0x73   : > { %v291_v12 = vrot.slane %v290_v8, 2  ;;  %v297_v13 = vmax.f32 %v295_v5, %v296_v9  ;;  %v277_v17 = vrot.slane %v276_v10, 2  ;;  %v283_v18 = vadd.f32 %v282_v11, %v281_v7  ;;  %s2294_s29 = sld [smem:[#allocation8 + $0x1d]]  ;;  %v474_v53 = vld [vmem:[#allocation9 + $0x1] ss:$8 sm:$0x3] }
  0x74   : > { %3784 = vst [vmem:[#allocation28_spill] sm:$0xff] %v2255_v34  ;;  %s2296_s7 = sld [smem:[#allocation8 + $0x24]]  ;;  %v595_v54 = vld [vmem:[#allocation9 + $0x3] ss:$8 sm:$0x3]  ;;  %v2415_v55 = vand.u32 127, %v312_v16  ;;  %v2418_v56 = vrot.slane %v424_v52, %v2270_v43  ;;  %v2426_v58 = vrot.slane %v424_v52, %v2272_v44  ;;  %v2429_v59 = vrot.slane %v474_v53, %v2270_v43 }
  0x75   : > { %v292_v19 = vmax.f32 %v290_v8, %v291_v12  ;;  %v298_v20 = vrot.slane %v297_v13, 2  ;;  %v278_v21 = vadd.f32 %v277_v17, %v276_v10  ;;  %v284_v22 = vrot.slane %v283_v18, 2  ;;  %3788 = sst [smem:[#allocation30_spill]] %s2286_s13  ;;  %v538_v61 = vld [vmem:[#allocation9 + $0x2] ss:$8 sm:$0x3] }
  0x76   : > { %3789 = sst [smem:[#allocation31_spill]] %s2288_s14  ;;  %v2432_v60 = vrot.slane %v474_v53, %v2272_v44  ;;  %v489_v63 = vstv %s2286_s13  ;;  %v2453_v8 = vrot.slane %v538_v61, %v2270_v43  ;;  %v2456_v9 = vrot.slane %v538_v61, %v2272_v44  ;;  %v717_v10 = vld [vmem:[#allocation9 + $0x4] ss:$8 sm:$0x3] }
  0x77   : > { %v293_v23 = vrot.slane %v292_v19, 1  ;;  %v299_v24 = vmax.f32 %v297_v13, %v298_v20  ;;  %v279_v27 = vrot.slane %v278_v21, 1  ;;  %v285_v28 = vadd.f32 %v284_v22, %v283_v18  ;;  %3790 = sst [smem:[#allocation32_spill]] %s2290_s22  ;;  %v781_v14 = vld [vmem:[#allocation9 + $0x5] ss:$8 sm:$0x3] }
  0x78   : > { %3791 = sst [smem:[#allocation33_spill]] %s2292_s28  ;;  %v507_v2 = vstv %s2292_s28  ;;  %v845_v20 = vld [vmem:[#allocation9 + $0x6] ss:$8 sm:$0x3]  ;;  %v2474_v22 = vrot.slane %v717_v10, %v2270_v43  ;;  %v2484_v26 = vrot.slane %v781_v14, %v2270_v43  ;;  %vm421_vm2 = vcmp.lt.s32.totalorder %v2415_v55, 3 }
  0x79   : > { %v294_v29 = vmax.f32 %v292_v19, %v293_v23  ;;  %v300_v30 = vrot.slane %v299_v24, 1  ;;  %v280_v31 = vadd.f32 %v279_v27, %v278_v21  ;;  %v286_v32 = vrot.slane %v285_v28, 1  ;;  %3792 = sst [smem:[#allocation34_spill]] %s2294_s29 }
  0x7a   : > { %3793 = sst [smem:[#allocation35_spill]] %s2296_s7  ;;  %v2477_v23 = vrot.slane %v717_v10, %v2272_v44  ;;  %v2487_v27 = vrot.slane %v781_v14, %v2272_v44  ;;  %vm470_vm3 = vcmp.lt.s32.totalorder %v2415_v55, 2  ;;  %vm534_vm4 = vcmp.lt.s32.totalorder %v2415_v55, 1 }
  0x7b   : > { %v301_v33 = vmax.f32 %v299_v24, %v300_v30  ;;  %v287_v35 = vadd.f32 %v286_v32, %v285_v28  ;;  %s2298_s8 = sld [smem:[#allocation8 + $0x2b]]  ;;  %v2500_v32 = vrot.slane %v845_v20, %v2272_v44  ;;  %vm713_vm5 = vcmp.lt.s32.totalorder %v2415_v55, 127 }
  0x7c   : > { %s2300_s11 = sld [smem:[#allocation8]]  ;;  %vm777_vm6 = vcmp.lt.s32.totalorder %v2415_v55, 126  ;;  %vm841_vm7 = vcmp.lt.s32.totalorder %v2415_v55, 125  ;;  %vm1350_vm8 = vcmp.lt.s32.totalorder %v2415_v55, 32  ;;  %vm1329_vm9 = vcmp.lt.s32.totalorder %v2415_v55, 48 }
  0x7d   : > { %v331_v36 = vcombine.low %v294_v29, %v301_v33  ;;  %v308_v37 = vcombine.low %v280_v31, %v287_v35  ;;  %s2302_s12 = sld [smem:[#allocation8 + $0x7]]  ;;  %v2497_v31 = vrot.slane %v845_v20, %v2270_v43  ;;  %vm1374_vm10 = vcmp.lt.s32.totalorder %v2415_v55, 16 }
  0x7e   : > { %s2308_s0 = sld [smem:[#allocation8 + $0x1c]]  ;;  %vm1415_vm11 = vcmp.lt.s32.totalorder %v2415_v55, 112  ;;  %vm1439_vm12 = vcmp.lt.s32.totalorder %v2415_v55, 96  ;;  %vm1463_vm13 = vcmp.lt.s32.totalorder %v2415_v55, 80 }
  0x7f   : > { %v338_v38 = vrot.slane %v331_v36, %v2255_v34  ;;  %v315_v40 = vrot.slane %v308_v37, %v2255_v34  ;;  %s2310_s1 = sld [smem:[#allocation8 + $0x23]] }
  0x80   : > { %s2312_s2 = sld [smem:[#allocation8 + $0x2a]] }
  0x81   : > { %v345_v41 = vrot.slane %v338_v38, %v2255_v34  ;;  %v322_v42 = vrot.slane %v315_v40, %v2255_v34  ;;  %3794 = sst [smem:[#allocation36_spill]] %s2298_s8 }
  0x82   : > { %3795 = sst [smem:[#allocation37_spill]] %s2300_s11 }
  0x83   : > { %347 = vst.msk [vmem:[#allocation3] sm:$0x3] %vm2259_vm1, %v345_v41  ;;  %328 = vst.msk [vmem:[#allocation2] sm:$0x3] %vm2259_vm1, %v322_v42  ;;  %3796 = sst [smem:[#allocation38_spill]] %s2302_s12 }
  0x84   : > { %3799 = sst [smem:[#allocation41_spill]] %s2308_s0 }
  0x85   : > { %3800 = sst [smem:[#allocation42_spill]] %s2310_s1 }
  0x86   : > { %3801 = sst [smem:[#allocation43_spill]] %s2312_s2 }
  0x87   : > { %s2314_s3 = sld [smem:[#allocation8 + $0x2]] }
  0x88   : > { %s2316_s30 = sld [smem:[#allocation8 + $0x9]] }
  0x89   : > { %s2318_s19 = sld [smem:[#allocation8 + $0x10]] }
  0x8a   : > { %v2274_v45 = vld [vmem:[#allocation3] sm:$0x3]  ;;  %v401_v48 = vld [vmem:[#allocation2] sm:$0x3]  ;;  %s2320_s10 = sld [smem:[#allocation8 + $0x17]] }
  0x8b   : > { %v909_v46 = vrot.slane %v2274_v45, %v2272_v44  ;;  %v905_v47 = vrot.slane %v2274_v45, %v2270_v43  ;;  %v2280_v49 = vmul.f32 0.25, %v401_v48  ;;  %s2324_s17 = sld [smem:[#allocation8 + $0x25]]  ;;  %v2423_v57 = vmul.f32 %v595_v54, %v2274_v45 }
  0x8c   : > { %s2326_s16 = sld [smem:[#allocation8 + $0x2c]] }
  0x8d   : > { %914 = vrot.lane.b32.xlu1 %v909_v46, %s2070_s23  ;;  %912 = vrot.lane.b32.xlu0 %v905_v47, %s2070_s23  ;;  %v408_v50 = vrot.slane %v2280_v49, %v2270_v43  ;;  %v412_v51 = vrot.slane %v2280_v49, %v2272_v44  ;;  %3802 = sst [smem:[#allocation44_spill]] %s2314_s3  ;;  %v2437_v62 = vmul.f32 %v595_v54, %v2280_v49 }
  0x8e   : > { %3803 = sst [smem:[#allocation45_spill]] %s2316_s30 }
  0x8f   : > { %3804 = sst [smem:[#allocation46_spill]] %s2318_s19 }
  0x90   : > { %3805 = sst [smem:[#allocation47_spill]] %s2320_s10 }
  0x91   : > { %964 = vrot.lane.b32.xlu1 %v909_v46, %s2071_s25  ;;  %962 = vrot.lane.b32.xlu0 %v905_v47, %s2071_s25  ;;  %3807 = sst [smem:[#allocation49_spill]] %s2324_s17 }
  0x92   : > { %3808 = sst [smem:[#allocation50_spill]] %s2326_s16 }
  0x93   : > { %s2328_s20 = sld [smem:[#allocation8 + $0x19]] }
  0x94   : > { %s2332_s26 = sld [smem:[#allocation8 + $0x3]] }
  0x95   : > { %466 = vrot.lane.b32.xlu1 %v408_v50, %s2071_s25  ;;  %415 = vrot.lane.b32.xlu0 %v408_v50, %s2070_s23  ;;  %s2334_s15 = sld [smem:[#allocation8 + $0x4]] }
  0x96   : > { %s2336_s4 = sld [smem:[#allocation8 + $0x31]] }
  0x97   : > { %s2338_s5 = sld [smem:[#allocation8 + $0x5]] }
  0x98   : > { %s2342_s18 = sld [smem:[#allocation8 + $0xa]] }
  0x99   : > { %468 = vrot.lane.b32.xlu1 %v412_v51, %s2071_s25  ;;  %417 = vrot.lane.b32.xlu0 %v412_v51, %s2070_s23  ;;  %s2304_s23 = sld [smem:[#allocation8 + $0xe]] }
  0x9a   : > { %s2306_s25 = sld [smem:[#allocation8 + $0x15]]  ;;  %v598_v15 = vstv %s2332_s26 }
  0x9b   : > { %3809 = sst [smem:[#allocation51_spill]] %s2328_s20  ;;  %v2490_v28 = vmul.f32 %v598_v15, %v2437_v62 }
  0x9c   : > { %3811 = sst [smem:[#allocation53_spill]] %s2334_s15 }
  0x9d   : > { %532 = vrot.lane.b32.xlu1 %v412_v51, %s2072_s27  ;;  %530 = vrot.lane.b32.xlu0 %v408_v50, %s2072_s27  ;;  %3812 = sst [smem:[#allocation54_spill]] %s2336_s4 }
  0x9e   : > { %3813 = sst [smem:[#allocation55_spill]] %s2338_s5  ;;  %v614_v24 = vstv %s2342_s18 }
  0x9f   : > { %3797 = sst [smem:[#allocation39_spill]] %s2304_s23  ;;  %v2508_v37 = vmul.f32 %v614_v24, %v2437_v62 }
  0xa0   : > { %3798 = sst [smem:[#allocation40_spill]] %s2306_s25 }
  0xa1   : > { %711 = vrot.lane.b32.xlu1 %v412_v51, %s2073_s24  ;;  %709 = vrot.lane.b32.xlu0 %v408_v50, %s2073_s24  ;;  %s2344_s6 = sld [smem:[#allocation8 + $0xb]] }
  0xa2   : > { %s2346_s16 = sld [smem:[#allocation8 + $0x6]] }
  0xa3   : > { %s2348_s20 = sld [smem:[#allocation8 + $0xc]] }
  0xa4   : > { %s2354_s17 = sld [smem:[#allocation8 + $0x33]] }
  0xa5   : > { %775 = vrot.lane.b32.xlu1 %v412_v51, %s2074_s21  ;;  %773 = vrot.lane.b32.xlu0 %v408_v50, %s2074_s21  ;;  %s2356_s15 = sld [smem:[#allocation8 + $0xd]] }
  0xa6   : > { %s2358_s4 = sld [smem:[#allocation8 + $0x34]] }
  0xa7   : > { %3815 = sst [smem:[#allocation57_spill]] %s2344_s6 }
  0xa8   : > { %3816 = sst [smem:[#allocation58_spill]] %s2346_s16 }
  0xa9   : > { %839 = vrot.lane.b32.xlu1 %v412_v51, %s2075_s9  ;;  %837 = vrot.lane.b32.xlu0 %v408_v50, %s2075_s9  ;;  %3817 = sst [smem:[#allocation59_spill]] %s2348_s20 }
  0xaa   : > { %3820 = sst [smem:[#allocation62_spill]] %s2354_s17 }
  0xab   : > { %3821 = sst [smem:[#allocation63_spill]] %s2356_s15 }
  0xac   : > { %3822 = sst [smem:[#allocation64_spill]] %s2358_s4 }
  0xad   : > { %1014 = vrot.lane.b32.xlu1 %v909_v46, %s2072_s27  ;;  %1012 = vrot.lane.b32.xlu0 %v905_v47, %s2072_s27  ;;  %s2322_s27 = sld [smem:[#allocation8 + $0x1e]] }
  0xae   : > { %s2360_s5 = sld [smem:[#allocation8 + $0x3f]] }
  0xaf   : > { %s2366_s6 = sld [smem:[#allocation8 + $0x11]] }
  0xb0   : > { %s2368_s16 = sld [smem:[#allocation8 + $0x3b]] }
  0xb1   : > { %1177 = vrot.lane.b32.xlu1 %v909_v46, %s2073_s24  ;;  %1175 = vrot.lane.b32.xlu0 %v905_v47, %s2073_s24  ;;  %s2330_s24 = sld [smem:[#allocation8 + $0x1a]] }
  0xb2   : > { %s2370_s20 = sld [smem:[#allocation8 + $0x36]] }
  0xb3   : > { %3806 = sst [smem:[#allocation48_spill]] %s2322_s27 }
  0xb4   : > { %3823 = sst [smem:[#allocation65_spill]] %s2360_s5 }
  0xb5   : > { %1227 = vrot.lane.b32.xlu1 %v909_v46, %s2074_s21  ;;  %1225 = vrot.lane.b32.xlu0 %v905_v47, %s2074_s21  ;;  %s2340_s21 = sld [smem:[#allocation8 + $0x32]] }
  0xb6   : > { %s2364_s27 = sld [smem:[#allocation8 + $0x3a]] }
  0xb7   : > { %3810 = sst [smem:[#allocation52_spill]] %s2330_s24 }
  0xb8   : > { %s2352_s24 = sld [smem:[#allocation8 + $0x39]] }
  0xb9   : > { %1277 = vrot.lane.b32.xlu1 %v909_v46, %s2075_s9  ;;  %1275 = vrot.lane.b32.xlu0 %v905_v47, %s2075_s9  ;;  %s2350_s9 = sld [smem:[#allocation8 + $0x38]] }
  0xba   : > { %3826 = sst [smem:[#allocation68_spill]] %s2366_s6 }
  0xbb   : > { %3814 = sst [smem:[#allocation56_spill]] %s2340_s21 }
  0xbc   : > { %s2362_s21 = sld [smem:[#allocation8 + $0x35]] }
  0xbd   : > { %3825 = sst [smem:[#allocation67_spill]] %s2364_s27 }
  0xbe   : > { %3819 = sst [smem:[#allocation61_spill]] %s2352_s24 }
  0xbf   : > { %3818 = sst [smem:[#allocation60_spill]] %s2350_s9 }
  0xc0   : > { %3827 = sst [smem:[#allocation69_spill]] %s2368_s16 }
  0xc1   : > { %3828 = sst [smem:[#allocation70_spill]] %s2370_s20 }
  0xc2   : > { %3824 = sst [smem:[#allocation66_spill]] %s2362_s21 }
  0xc3   : > { %s2372_s9 = sld [smem:[#allocation8 + $0x3c]] }
  0xc4   : > { %s2374_s24 = sld [smem:[#allocation8 + $0x12]] }
  0xc5   : > { %s2376_s17 = sld [smem:[#allocation8 + $0x37]] }
  0xc6   : > { %s2378_s15 = sld [smem:[#allocation8 + $0x13]] }
  0xc7   : > { %s2380_s4 = sld [smem:[#allocation8 + $0x3d]] }
  0xc8   : > { %s2382_s5 = sld [smem:[#allocation8 + $0x40]] }
  0xc9   : > { %3829 = sst [smem:[#allocation71_spill]] %s2372_s9 }
  0xca   : > { %3830 = sst [smem:[#allocation72_spill]] %s2374_s24 }
  0xcb   : > { %3831 = sst [smem:[#allocation73_spill]] %s2376_s17 }
  0xcc   : > { %3832 = sst [smem:[#allocation74_spill]] %s2378_s15 }
  0xcd   : > { %3833 = sst [smem:[#allocation75_spill]] %s2380_s4 }
  0xce   : > { %3834 = sst [smem:[#allocation76_spill]] %s2382_s5 }
  0xcf   : > { %s2384_s21 = sld [smem:[#allocation8 + $0x1f]] }
  0xd0   : > { %s2386_s27 = sld [smem:[#allocation8 + $0x14]] }
  0xd1   : > { %s2388_s6 = sld [smem:[#allocation8 + $0x3e]] }
  0xd2   : > { %s2390_s16 = sld [smem:[#allocation8 + $0x20]] }
  0xd3   : > { %s2392_s20 = sld [smem:[#allocation8 + $0x4d]] }
  0xd4   : > { %s2394_s9 = sld [smem:[#allocation8 + $0x41]] }
  0xd5   : > { %3835 = sst [smem:[#allocation77_spill]] %s2384_s21 }
  0xd6   : > { %3836 = sst [smem:[#allocation78_spill]] %s2386_s27 }
  0xd7   : > { %3837 = sst [smem:[#allocation79_spill]] %s2388_s6 }
  0xd8   : > { %3838 = sst [smem:[#allocation80_spill]] %s2390_s16 }
  0xd9   : > { %3839 = sst [smem:[#allocation81_spill]] %s2392_s20 }
  0xda   : > { %s2396_s24 = sld [smem:[#allocation8 + $0x21]] }
  0xdb   : > { %s2398_s17 = sld [smem:[#allocation8 + $0x42]] }
  0xdc   : > { %s2400_s15 = sld [smem:[#allocation8 + $0x4e]] }
  0xdd   : > { %s2402_s4 = sld [smem:[#allocation8 + $0x43]] }
  0xde   : > { %s2404_s5 = sld [smem:[#allocation8 + $0x22]] }
  0xdf   : > { %s2406_s21 = sld [smem:[#allocation8 + $0x26]] }
  0xe0   : > { %3840 = sst [smem:[#allocation82_spill]] %s2396_s24 }
  0xe1   : > { %s2408_s6 = sld [smem:[#allocation8 + $0x27]] }
  0xe2   : > { %s2410_s20 = sld [smem:[#allocation8 + $0x44]]  ;;  %v995_v33 = vstv %s2400_s15 }
  0xe3   : > { %3841 = sst [smem:[#allocation83_spill]] %s2402_s4 }
  0xe4   : > { %3842 = sst [smem:[#allocation84_spill]] %s2404_s5 }
  0xe5   : > { %s2412_s24 = sld [smem:[#allocation8 + $0x4f]]  ;;  %v678_v54 = vstv %s2406_s21 }
  0xe6   : > { %s2420_s5 = sld [smem:[#allocation8 + $0x28]]  ;;  %v2604_v52 = vmul.f32 %v678_v54, %v2437_v62 }
  0xe7   : > { %3843 = sst [smem:[#allocation85_spill]] %s2408_s6 }
  0xe8   : > { %3844 = sst [smem:[#allocation86_spill]] %s2410_s20  ;;  %3890 = vst [vmem:[#allocation94_spill] sm:$0xff] %v2604_v52 }
  0xe9   : > { %s2458_s22 = sld [smem:[#allocation8 + $0x29]] }
  0xea   : > { %s2464_s8 = sld [smem:[#allocation8 + $0x54]] }
  0xeb   : > { %3845 = sst [smem:[#allocation87_spill]] %s2412_s24 }
  0xec   : > { %3846 = sst [smem:[#allocation88_spill]] %s2420_s5 }
  0xed   : > { %s2434_s24 = sld [smem:[#allocation8 + $0x45]] }
  0xee   : > { %s2442_s5 = sld [smem:[#allocation8 + $0x50]] }
  0xef   : > { %3848 = sst [smem:[#allocation90_spill]] %s2458_s22 }
  0xf0   : > { %s2470_s7 = sld [smem:[#allocation8 + $0x55]] }
  0xf1   : > { %s3854_s0 = sld [smem:[#allocation64_spill]] }
  0xf2   : > { %s2480_s26 = sld [smem:[#allocation8 + $0x52]] }
  0xf3   : > { %3847 = sst [smem:[#allocation89_spill]] %s2434_s24 }
  0xf4   : > { %s2448_s24 = sld [smem:[#allocation8 + $0x51]]  ;;  %v1128_v38 = vstv %s2442_s5 }
  0xf5   : > { %s3857_s3 = sld [smem:[#allocation54_spill]] }
  0xf6   : > { %3851 = sst [smem:[#allocation91_spill]] %s2470_s7 }
  0xf7   : > { %s3858_s19 = sld [smem:[#allocation68_spill]]  ;;  %v1064_v36 = vstv %s3854_s0 }
  0xf8   : > { %s2492_s1 = sld [smem:[#allocation8 + $0x56]]  ;;  %v2529_v51 = vmul.f32 %v1064_v36, %v2423_v57 }
  0xf9   : > { %s3861_s10 = sld [smem:[#allocation69_spill]] }
  0xfa   : > { %s2502_s25 = sld [smem:[#allocation8 + $0x2d]] }
  0xfb   : > { %s3863_s13 = sld [smem:[#allocation56_spill]]  ;;  %v921_v41 = vstv %s3857_s3 }
  0xfc   : > { %s2510_s12 = sld [smem:[#allocation8 + $0x53]] }
  0xfd   : > { %v630_v42 = vstv %s3858_s19  ;;  %s2516_s7 = sld [smem:[#allocation8 + $0x57]] }
  0xfe   : > { %3859 = sst [smem:[#allocation64_spill]] %s2492_s1  ;;  %v2539_v10 = vmul.f32 %v630_v42, %v2437_v62  ;;  %v1096_v42 = vstv %s2398_s17 }
  0xff   : > { %s3867_s1 = sld [smem:[#allocation60_spill]]  ;;  %v1080_v48 = vstv %s3861_s10  ;;  %v913_v30 = vpop.permute.xlu0 %912 }
 0x100   : > { %s3868_s29 = sld [smem:[#allocation61_spill]]  ;;  %v2545_v15 = vmul.f32 %v1080_v48, %v2423_v57  ;;  %v2593_v48 = vmul.f32 %v1096_v42, %v2423_v57  ;;  %v694_v54 = vstv %s2502_s25  ;;  %v951_v42 = vstv %s2464_s8 }
 0x101   : > { %s3869_s0 = sld [smem:[#allocation77_spill]]  ;;  %v971_v50 = vstv %s3863_s13  ;;  %v2644_v36 = vmul.f32 %v694_v54, %v2437_v62 }
 0x102   : > { %3865 = sst [smem:[#allocation68_spill]] %s2510_s12  ;;  %3888 = vst [vmem:[#allocation93_spill] sm:$0xff] %v2593_v48 }
 0x103   : > { %s2524_s23 = sld [smem:[#allocation8 + $0x58]]  ;;  %v1144_v45 = vstv %s2516_s7  ;;  %3897 = vst [vmem:[#allocation96_spill] sm:$0xff] %v2644_v36  ;;  %v963_v29 = vpop.permute.xlu0 %962 }
 0x104   : > { %s3872_s19 = sld [smem:[#allocation63_spill]]  ;;  %v2653_v46 = vmul.f32 %v1144_v45, %v2423_v57 }
 0x105   : > { %s3873_s3 = sld [smem:[#allocation65_spill]]  ;;  %v927_v61 = vstv %s3867_s1 }
 0x106   : > { %s2532_s12 = sld [smem:[#allocation8 + $0x2e]]  ;;  %v977_v14 = vstv %s3868_s29  ;;  %3900 = vst [vmem:[#allocation97_spill] sm:$0xff] %v2653_v46 }
 0x107   : > { %s2541_s14 = sld [smem:[#allocation8 + $0x2f]]  ;;  %v662_v24 = vstv %s3869_s0  ;;  %v416_v17 = vpop.permute.xlu0 %415 }
 0x108   : > { %s2550_s28 = sld [smem:[#allocation8 + $0x30]]  ;;  %v2571_v53 = vmul.f32 %v662_v24, %v2437_v62  ;;  %v2618_v24 = vmul.f32 %v1128_v38, %v2423_v57  ;;  %v915_v38 = vpop.permute.xlu1 %914 }
 0x109   : > { %s2564_s0 = sld [smem:[#allocation8 + $0x5b]]  ;;  %v916_v18 = vsel %vm421_vm2, %v913_v30, %v915_v38  ;;  %v917_v16 = vsel %vm421_vm2, %v915_v38, %v913_v30 }
 0x10a   : > { %s3883_s30 = sld [smem:[#allocation76_spill]]  ;;  %3884 = vst [vmem:[#allocation92_spill] sm:$0xff] %v2571_v53  ;;  %3894 = vst [vmem:[#allocation95_spill] sm:$0xff] %v2618_v24  ;;  %v2708_v38 = vmul.f32 %v916_v18, %v2426_v58 }
 0x10b   : > { %v933_v35 = vstv %s3873_s3  ;;  %s2573_s2 = sld [smem:[#allocation8 + $0x5c]]  ;;  %v418_v12 = vpop.permute.xlu0 %417 }
 0x10c   : > { %3874 = sst [smem:[#allocation69_spill]] %s2532_s12  ;;  %v965_v40 = vpop.permute.xlu1 %964  ;;  %3907 = vst [vmem:[#allocation102_spill] sm:$0xff] %v2708_v38  ;;  %v2748_v3 = vmul.f32 %v927_v61, %v2708_v38  ;;  %v2769_v5 = vmul.f32 %v933_v35, %v2708_v38 }
 0x10d   : > { %3877 = sst [smem:[#allocation77_spill]] %s2541_s14  ;;  %v966_v4 = vsel %vm470_vm3, %v963_v29, %v965_v40 }
 0x10e   : > { %s2556_s14 = sld [smem:[#allocation8 + $0x59]]  ;;  %3913 = vst [vmem:[#allocation105_spill] sm:$0xff] %v2769_v5 }
 0x10f   : > { %s2580_s13 = sld [smem:[#allocation8 + $0x5a]]  ;;  %v3723_v47 = vstv %s2564_s0 }
 0x110   : > { %s3887_s10 = sld [smem:[#allocation81_spill]]  ;;  %v983_v20 = vstv %s3883_s30 }
 0x111   : > { %s2588_s11 = sld [smem:[#allocation8 + $0x5d]] }
 0x112   : > { %s2596_s21 = sld [smem:[#allocation8 + $0x5e]] }
 0x113   : > { %s2606_s27 = sld [smem:[#allocation8 + $0x18]] }
 0x114   : > { %s2613_s18 = sld [smem:[#allocation8 + $0x5f]] }
 0x115   : > { %s2621_s1 = sld [smem:[#allocation8 + $0x49]] }
 0x116   : > { %v945_v49 = vstv %s3887_s10  ;;  %s2628_s17 = sld [smem:[#allocation8 + $0x1b]] }
 0x117   : > { %s3895_s25 = sld [smem:[#allocation91_spill]] }
 0x118   : > { %s2637_s12 = sld [smem:[#allocation8 + $0x46]]  ;;  %v1160_v19 = vstv %s2596_s21 }
 0x119   : > { %s3896_s7 = sld [smem:[#allocation68_spill]]  ;;  %v646_v45 = vstv %s2606_s27  ;;  %v2682_v25 = vmul.f32 %v1160_v19, %v2423_v57  ;;  %v422_v19 = vsel %vm421_vm2, %v416_v17, %v418_v12 }
 0x11a   : > { %s3898_s6 = sld [smem:[#allocation64_spill]]  ;;  %v2691_v11 = vmul.f32 %v646_v45, %v2437_v62  ;;  %v2705_v62 = vmul.f32 %v917_v16, %v2418_v56  ;;  %v467_v45 = vpop.permute.xlu1 %466  ;;  %v2732_v16 = vmul.f32 %v966_v4, %v2432_v60  ;;  %v437_v6 = vmul.f32 %v2426_v58, %v422_v19 }
 0x11b   : > { %s2646_s20 = sld [smem:[#allocation8 + $0x47]]  ;;  %3903 = vst [vmem:[#allocation98_spill] sm:$0xff] %v2682_v25  ;;  %v1112_v54 = vstv %s2621_s1 }
 0x11c   : > { %s3899_s5 = sld [smem:[#allocation69_spill]]  ;;  %3904 = vst [vmem:[#allocation99_spill] sm:$0xff] %v2691_v11  ;;  %v2702_v30 = vmul.f32 %v1112_v54, %v2423_v57  ;;  %3906 = vst [vmem:[#allocation101_spill] sm:$0xff] %v2705_v62  ;;  %v967_v54 = vsel %vm470_vm3, %v965_v40, %v963_v29  ;;  %v2738_v29 = vmul.f32 %v921_v41, %v2708_v38 }
 0x11d   : > { %s2655_s16 = sld [smem:[#allocation8 + $0x60]]  ;;  %v1001_v21 = vstv %s3895_s25  ;;  %3910 = vst [vmem:[#allocation103_spill] sm:$0xff] %v2732_v16  ;;  %v2743_v40 = vmul.f32 %v921_v41, %v2705_v62  ;;  %v2751_v4 = vmul.f32 %v967_v54, %v2429_v59  ;;  %v2760_v41 = vmul.f32 %v927_v61, %v2705_v62 }
 0x11e   : > { %s3901_s29 = sld [smem:[#allocation77_spill]]  ;;  %3905 = vst [vmem:[#allocation100_spill] sm:$0xff] %v2702_v30  ;;  %v469_v18 = vpop.permute.xlu1 %468  ;;  %v423_v54 = vsel %vm421_vm2, %v418_v12, %v416_v17  ;;  %v2774_v13 = vmul.f32 %v933_v35, %v2705_v62  ;;  %v2782_v12 = vmul.f32 %v945_v49, %v2708_v38  ;;  %v2787_v17 = vmul.f32 %v945_v49, %v2705_v62 }
 0x11f   : > { %s2661_s4 = sld [smem:[#allocation8 + $0x48]]  ;;  %3912 = vst [vmem:[#allocation104_spill] sm:$0xff] %v2751_v4  ;;  %v471_v57 = vsel %vm470_vm3, %v467_v45, %v469_v18  ;;  %v472_v7 = vsel %vm470_vm3, %v469_v18, %v467_v45  ;;  %v2807_v49 = vmul.f32 %v3723_v47, %v2708_v38  ;;  %v436_v18 = vmul.f32 %v2418_v56, %v423_v54 }
 0x120   : > { %s2667_s22 = sld [smem:[#allocation8 + $0x61]]  ;;  %3914 = vst [vmem:[#allocation106_spill] sm:$0xff] %v2774_v13  ;;  %v486_v45 = vmul.f32 %v2429_v59, %v472_v7  ;;  %v487_v61 = vmul.f32 %v2432_v60, %v471_v57  ;;  %3916 = vst [vmem:[#allocation107_spill] sm:$0xff] %v2782_v12  ;;  %v531_v59 = vpop.permute.xlu0 %530  ;;  %v2792_v60 = vmul.f32 %v971_v50, %v2732_v16 }
 0x121   : > { %s2676_s21 = sld [smem:[#allocation8 + $0x4a]]  ;;  %3917 = vst [vmem:[#allocation108_spill] sm:$0xff] %v2787_v17  ;;  %v2797_v7 = vmul.f32 %v951_v42, %v2708_v38  ;;  %v2802_v57 = vmul.f32 %v951_v42, %v2705_v62  ;;  %3922 = vst [vmem:[#allocation111_spill] sm:$0xff] %v2807_v49  ;;  %v2815_v1 = vmul.f32 %v971_v50, %v2751_v4 }
 0x122   : > { %v533_v35 = vpop.permute.xlu1 %532  ;;  %s3923_s27 = sld [smem:[#allocation31_spill]]  ;;  %v2820_v42 = vmul.f32 %v977_v14, %v2732_v16  ;;  %v2825_v47 = vmul.f32 %v977_v14, %v2751_v4  ;;  %v2830_v56 = vmul.f32 %v983_v20, %v2732_v16  ;;  %v2835_v58 = vmul.f32 %v983_v20, %v2751_v4 }
 0x123   : > { %3919 = vst [vmem:[#allocation109_spill] sm:$0xff] %v2797_v7  ;;  %3921 = vst [vmem:[#allocation110_spill] sm:$0xff] %v2802_v57  ;;  %s3925_s8 = sld [smem:[#allocation32_spill]]  ;;  %v2840_v50 = vmul.f32 %v995_v33, %v2732_v16  ;;  %v508_v19 = vmul.f32 %v507_v2, %v486_v45  ;;  %v509_v14 = vmul.f32 %v507_v2, %v487_v61 }
 0x124   : > { %3924 = vst [vmem:[#allocation112_spill] sm:$0xff] %v2825_v47  ;;  %3926 = vst [vmem:[#allocation113_spill] sm:$0xff] %v2830_v56  ;;  %s3930_s1 = sld [smem:[#allocation34_spill]]  ;;  %v2849_v54 = vmul.f32 %v995_v33, %v2751_v4  ;;  %v2854_v20 = vmul.f32 %v1001_v21, %v2732_v16  ;;  %v2858_v0 = vmul.f32 %v489_v63, %v486_v45  ;;  %v710_v2 = vpop.permute.xlu0 %709 }
 0x125   : > { %3928 = vst [vmem:[#allocation114_spill] sm:$0xff] %v2835_v58  ;;  %3929 = vst [vmem:[#allocation115_spill] sm:$0xff] %v2840_v50  ;;  %s3932_s30 = sld [smem:[#allocation35_spill]]  ;;  %v491_v39 = vmul.f32 %v489_v63, %v487_v61  ;;  %v2870_v33 = vmul.f32 %v1001_v21, %v2751_v4 }
 0x126   : > { %3931 = vst [vmem:[#allocation116_spill] sm:$0xff] %v2849_v54  ;;  %3933 = vst [vmem:[#allocation117_spill] sm:$0xff] %v2854_v20  ;;  %v712_v38 = vpop.permute.xlu1 %711  ;;  %s3935_s15 = sld [smem:[#allocation36_spill]] }
 0x127   : > { %3902 = sst [smem:[#allocation63_spill]] %s2676_s21  ;;  %3936 = vst [vmem:[#allocation118_spill] sm:$0xff] %v2870_v33 }
 0x128   : > { %s3927_s21 = sld [smem:[#allocation40_spill]]  ;;  %v3934_v34 = vstv %s3923_s27 }
 0x129   : > { %v2864_v30 = vmul.f32 %v3934_v34, %v486_v45  ;;  %v3937_v25 = vmov %v3934_v34  ;;  %v3938_v49 = vstv %s3925_s8  ;;  %s3942_s3 = sld [smem:[#allocation37_spill]] }
 0x12a   : > { %v2874_v11 = vmul.f32 %v3937_v25, %v487_v61  ;;  %v2878_v62 = vmul.f32 %v3938_v49, %v486_v45  ;;  %v3941_v46 = vmov %v3938_v49  ;;  %v3943_v20 = vstv %s3930_s1  ;;  %s3946_s25 = sld [smem:[#allocation38_spill]] }
 0x12b   : > { %v2886_v36 = vmul.f32 %v3941_v46, %v487_v61  ;;  %v2890_v7 = vmul.f32 %v3943_v20, %v486_v45  ;;  %v3945_v21 = vmov %v3943_v20  ;;  %v3948_v4 = vstv %s3932_s30  ;;  %s3950_s10 = sld [smem:[#allocation39_spill]] }
 0x12c   : > { %v2894_v25 = vmul.f32 %v3945_v21, %v487_v61  ;;  %v2898_v49 = vmul.f32 %v3948_v4, %v486_v45  ;;  %v535_v46 = vsel %vm534_vm4, %v531_v59, %v533_v35  ;;  %s3951_s27 = sld [smem:[#allocation41_spill]]  ;;  %v536_v20 = vsel %vm534_vm4, %v533_v35, %v531_v59 }
 0x12d   : > { %3944 = vst [vmem:[#allocation119_spill] sm:$0xff] %v2890_v7  ;;  %v3952_v33 = vmov %v3948_v4  ;;  %s3953_s8 = sld [smem:[#allocation47_spill]]  ;;  %v3955_v21 = vstv %s3935_s15  ;;  %v2913_v4 = vmul.f32 %v2453_v8, %v536_v20 }
 0x12e   : > { %v3939_v63 = vstv %s3927_s21  ;;  %3947 = vst [vmem:[#allocation120_spill] sm:$0xff] %v2894_v25  ;;  %3949 = vst [vmem:[#allocation121_spill] sm:$0xff] %v2898_v49  ;;  %v2906_v54 = vmul.f32 %v3952_v33, %v487_v61  ;;  %v2910_v24 = vmul.f32 %v3955_v21, %v486_v45  ;;  %s3957_s21 = sld [smem:[#allocation42_spill]]  ;;  %v3958_v35 = vmov %v3955_v21 }
 0x12f   : > { %v452_v16 = vmul.f32 %v3939_v63, %v436_v18  ;;  %v3940_v34 = vmov %v3939_v63  ;;  %v2920_v59 = vmul.f32 %v3958_v35, %v487_v61  ;;  %s3963_s1 = sld [smem:[#allocation44_spill]]  ;;  %v715_v61 = vsel %vm713_vm5, %v712_v38, %v710_v2 }
 0x130   : > { %v453_v57 = vmul.f32 %v3940_v34, %v437_v6  ;;  %3954 = vst [vmem:[#allocation122_spill] sm:$0xff] %v2906_v54  ;;  %3956 = vst [vmem:[#allocation123_spill] sm:$0xff] %v2910_v24  ;;  %v3962_v45 = vstv %s3946_s25  ;;  %s3967_s30 = sld [smem:[#allocation43_spill]] }
 0x131   : > { %v510_v63 = vadd.f32 %v508_v19, %v452_v16  ;;  %v2916_v16 = vmul.f32 %v2456_v9, %v535_v46  ;;  %v774_v19 = vpop.permute.xlu0 %773  ;;  %3959 = vst [vmem:[#allocation124_spill] sm:$0xff] %v2920_v59  ;;  %v2928_v21 = vmul.f32 %v3962_v45, %v436_v18  ;;  %v3964_v20 = vmov %v3962_v45  ;;  %s3978_s15 = sld [smem:[#allocation45_spill]] }
 0x132   : > { %v511_v34 = vadd.f32 %v509_v14, %v453_v57  ;;  %v776_v57 = vpop.permute.xlu1 %775  ;;  %v3960_v14 = vstv %s3942_s3  ;;  %v445_v24 = vmul.f32 %v3964_v20, %v437_v6  ;;  %v3965_v50 = vstv %s3950_s10  ;;  %s3979_s3 = sld [smem:[#allocation46_spill]] }
 0x133   : > { %v440_v33 = vmul.f32 %v3960_v14, %v436_v18  ;;  %v3961_v17 = vmov %v3960_v14  ;;  %v2934_v46 = vmul.f32 %v3965_v50, %v436_v18  ;;  %v3966_v52 = vmov %v3965_v50  ;;  %s3987_s25 = sld [smem:[#allocation53_spill]] }
 0x134   : > { %v441_v49 = vmul.f32 %v3961_v17, %v437_v6  ;;  %v2938_v12 = vmul.f32 %v3966_v52, %v437_v6  ;;  %v3968_v35 = vstv %s3951_s27  ;;  %v3970_v17 = vstv %s3953_s8  ;;  %s3989_s10 = sld [smem:[#allocation48_spill]] }
 0x135   : > { %v2944_v14 = vmul.f32 %v3968_v35, %v436_v18  ;;  %v572_v45 = vmul.f32 %v3970_v17, %v2913_v4  ;;  %v3971_v59 = vmov %v3970_v17  ;;  %v714_v50 = vsel %vm713_vm5, %v710_v2, %v712_v38  ;;  %s3993_s27 = sld [smem:[#allocation55_spill]] }
 0x136   : > { %v573_v20 = vmul.f32 %v3971_v59, %v2916_v16  ;;  %v3972_v52 = vmov %v3968_v35  ;;  %v3974_v54 = vstv %s3957_s21  ;;  %v779_v35 = vsel %vm777_vm6, %v776_v57, %v774_v19  ;;  %v840_v17 = vpop.permute.xlu1 %839  ;;  %v838_v59 = vpop.permute.xlu0 %837  ;;  %s3995_s8 = sld [smem:[#allocation49_spill]] }
 0x137   : > { %3969 = vst [vmem:[#allocation125_spill] sm:$0xff] %v2944_v14  ;;  %v2956_v58 = vmul.f32 %v3972_v52, %v437_v6  ;;  %v2960_v48 = vmul.f32 %v3974_v54, %v436_v18  ;;  %v3976_v13 = vmov %v3974_v54  ;;  %v3980_v7 = vstv %s3963_s1  ;;  %s3997_s21 = sld [smem:[#allocation58_spill]] }
 0x138   : > { %v2964_v56 = vmul.f32 %v3976_v13, %v437_v6  ;;  %v555_v38 = vmul.f32 %v3980_v7, %v2916_v16  ;;  %v2971_v2 = vadd.f32 %v572_v45, %v510_v63  ;;  %v2973_v52 = vadd.f32 %v573_v20, %v511_v34 }
 0x139   : > { %3973 = vst [vmem:[#allocation126_spill] sm:$0xff] %v2956_v58  ;;  %3975 = vst [vmem:[#allocation127_spill] sm:$0xff] %v2960_v48  ;;  %v2976_v54 = vmul.f32 %v2477_v23, %v715_v61  ;;  %v3983_v13 = vstv %s3967_s30  ;;  %v2987_v53 = vmul.f32 %v2474_v22, %v714_v50  ;;  %v778_v7 = vsel %vm777_vm6, %v774_v19, %v776_v57  ;;  %s4008_s30 = sld [smem:[#allocation59_spill]] }
 0x13a   : > { %3977 = vst [vmem:[#allocation128_spill] sm:$0xff] %v2964_v56  ;;  %3981 = vst [vmem:[#allocation129_spill] sm:$0xff] %v2971_v2  ;;  %v2980_v48 = vmul.f32 %v3983_v13, %v436_v18  ;;  %v3985_v56 = vmov %v3983_v13  ;;  %v3988_v63 = vstv %s3963_s1  ;;  %v2995_v61 = vmul.f32 %v2487_v27, %v779_v35  ;;  %v1015_v13 = vpop.permute.xlu1 %1014  ;;  %s4002_s1 = sld [smem:[#allocation57_spill]] }
 0x13b   : > { %3982 = vst [vmem:[#allocation130_spill] sm:$0xff] %v2973_v52  ;;  %v2984_v14 = vmul.f32 %v3985_v56, %v437_v6  ;;  %v554_v34 = vmul.f32 %v3988_v63, %v2913_v4  ;;  %v843_v6 = vsel %vm841_vm7, %v840_v17, %v838_v59  ;;  %v493_v18 = vadd.f32 %v491_v39, %v441_v49  ;;  %v1013_v63 = vpop.permute.xlu0 %1012 }
 0x13c   : > { %3984 = vst [vmem:[#allocation131_spill] sm:$0xff] %v2980_v48  ;;  %v3990_v56 = vstv %s3978_s15  ;;  %v3992_v57 = vstv %s3979_s3  ;;  %v842_v35 = vsel %vm841_vm7, %v838_v59, %v840_v17  ;;  %v3015_v52 = vmul.f32 %v2484_v26, %v778_v7  ;;  %s4010_s15 = sld [smem:[#allocation50_spill]] }
 0x13d   : > { %3986 = vst [vmem:[#allocation132_spill] sm:$0xff] %v2984_v14  ;;  %v3002_v45 = vmul.f32 %v3990_v56, %v2913_v4  ;;  %v3991_v20 = vmov %v3990_v56  ;;  %v3010_v19 = vmul.f32 %v3992_v57, %v2913_v4  ;;  %v3018_v39 = vmul.f32 %v2500_v32, %v843_v6  ;;  %s4014_s3 = sld [smem:[#allocation62_spill]] }
 0x13e   : > { %v561_v50 = vmul.f32 %v3991_v20, %v2916_v16  ;;  %v557_v49 = vadd.f32 %v555_v38, %v493_v18  ;;  %v3994_v56 = vstv %s3987_s25  ;;  %v3026_v2 = vmul.f32 %v3992_v57, %v2916_v16 }
 0x13f   : > { %v734_v20 = vmul.f32 %v3994_v56, %v2976_v54  ;;  %v3996_v17 = vstv %s3989_s10  ;;  %v492_v38 = vadd.f32 %v2858_v0, %v440_v33  ;;  %v3040_v6 = vmul.f32 %v2497_v31, %v842_v35  ;;  %v1176_v0 = vpop.permute.xlu0 %1175  ;;  %s4021_s10 = sld [smem:[#allocation66_spill]] }
 0x140   : > { %v3031_v59 = vmul.f32 %v3996_v17, %v2913_v4  ;;  %v3999_v7 = vmov %v3996_v17  ;;  %v1016_v18 = vsel %vm534_vm4, %v1013_v63, %v1015_v13  ;;  %v4001_v56 = vrot.slane %v2490_v28, %v2272_v44 }
 0x141   : > { %v3036_v48 = vmul.f32 %v3999_v7, %v2916_v16  ;;  %v4003_v17 = vstv %s3993_s27  ;;  %v1017_v7 = vsel %vm534_vm4, %v1015_v13, %v1013_v63  ;;  %v556_v33 = vadd.f32 %v554_v34, %v492_v38 }
 0x142   : > { %3998 = vst [vmem:[#allocation133_spill] sm:$0xff] %v3031_v59  ;;  %v612_v57 = vadd.f32 %v4001_v56, %v557_v49  ;;  %v798_v14 = vmul.f32 %v4003_v17, %v2995_v61  ;;  %v1178_v59 = vpop.permute.xlu1 %1177  ;;  %v4004_v35 = vstv %s3987_s25  ;;  %v4005_v25 = vstv %s3995_s8  ;;  %s4019_s25 = sld [smem:[#allocation67_spill]] }
 0x143   : > { %4000 = vst [vmem:[#allocation134_spill] sm:$0xff] %v3036_v48  ;;  %v733_v5 = vmul.f32 %v4004_v35, %v2987_v53  ;;  %v499_v48 = vadd.f32 %v2874_v11, %v445_v24  ;;  %v3059_v58 = vmul.f32 %v4005_v25, %v2913_v4  ;;  %v4007_v56 = vstv %s3997_s21 }
 0x144   : > { %v736_v49 = vadd.f32 %v734_v20, %v612_v57  ;;  %v862_v17 = vmul.f32 %v4007_v56, %v3018_v39  ;;  %v4009_v13 = vstv %s3993_s27  ;;  %v1180_v34 = vsel %vm713_vm5, %v1178_v59, %v1176_v0  ;;  %s4025_s27 = sld [smem:[#allocation70_spill]] }
 0x145   : > { %4006 = vst [vmem:[#allocation135_spill] sm:$0xff] %v3059_v58  ;;  %v797_v63 = vmul.f32 %v4009_v13, %v3015_v52  ;;  %v4011_v11 = vrot.slane %v2490_v28, %v2270_v43  ;;  %v563_v38 = vadd.f32 %v561_v50, %v499_v48  ;;  %v4012_v25 = vstv %s4002_s1  ;;  %v1226_v48 = vpop.permute.xlu0 %1225 }
 0x146   : > { %v740_v20 = vmul.f32 %v4012_v25, %v2976_v54  ;;  %v3076_v57 = vmul.f32 %v1017_v7, %v2453_v8  ;;  %v3079_v35 = vmul.f32 %v1016_v18, %v2456_v9  ;;  %v800_v56 = vadd.f32 %v798_v14, %v736_v49  ;;  %v1228_v28 = vpop.permute.xlu1 %1227 }
 0x147   : > { %v611_v24 = vadd.f32 %v4011_v11, %v556_v33  ;;  %v4013_v13 = vstv %s3997_s21  ;;  %v1179_v47 = vsel %vm713_vm5, %v1176_v0, %v1178_v59  ;;  %v4015_v8 = vrot.slane %v2508_v37, %v2272_v44  ;;  %s4031_s21 = sld [smem:[#allocation71_spill]] }
 0x148   : > { %v861_v58 = vmul.f32 %v4013_v13, %v3040_v6  ;;  %v4016_v9 = vstv %s4008_s30  ;;  %v4017_v14 = vstv %s3995_s8  ;;  %v4018_v49 = vstv %s4010_s15  ;;  %s4028_s8 = sld [smem:[#allocation73_spill]] }
 0x149   : > { %v735_v50 = vadd.f32 %v733_v5, %v611_v24  ;;  %v628_v7 = vadd.f32 %v4015_v8, %v563_v38  ;;  %v804_v18 = vmul.f32 %v4016_v9, %v2995_v61  ;;  %v3095_v33 = vmul.f32 %v4017_v14, %v2916_v16 }
 0x14a   : > { %v3100_v11 = vmul.f32 %v4018_v49, %v2913_v4  ;;  %v3103_v59 = vmul.f32 %v1180_v34, %v2477_v23  ;;  %v864_v5 = vadd.f32 %v862_v17, %v800_v56  ;;  %v1230_v0 = vsel %vm777_vm6, %v1228_v28, %v1226_v48  ;;  %v1276_v56 = vpop.permute.xlu0 %1275 }
 0x14b   : > { %v799_v24 = vadd.f32 %v797_v63, %v735_v50  ;;  %v742_v38 = vadd.f32 %v740_v20, %v628_v7  ;;  %v4020_v25 = vstv %s3872_s19  ;;  %v3111_v8 = vmul.f32 %v1179_v47, %v2474_v22  ;;  %v1278_v20 = vpop.permute.xlu1 %1277 }
 0x14c   : > { %v868_v13 = vmul.f32 %v4020_v25, %v3018_v39  ;;  %v925_v4 = vadd.f32 %v2738_v29, %v864_v5  ;;  %v4022_v9 = vstv %s4014_s3  ;;  %v1229_v63 = vsel %vm777_vm6, %v1226_v48, %v1228_v28  ;;  %s4037_s3 = sld [smem:[#allocation75_spill]] }
 0x14d   : > { %v1023_v23 = vmul.f32 %v4022_v9, %v3079_v35  ;;  %v4023_v17 = vmov %v4022_v9  ;;  %v863_v50 = vadd.f32 %v861_v58, %v799_v24  ;;  %v806_v7 = vadd.f32 %v804_v18, %v742_v38 }
 0x14e   : > { %v1022_v34 = vmul.f32 %v4023_v17, %v3076_v57  ;;  %v4024_v14 = vstv %s4019_s25  ;;  %v3126_v47 = vmul.f32 %v1230_v0, %v2487_v27  ;;  %v1280_v29 = vsel %vm841_vm7, %v1278_v20, %v1276_v56 }
 0x14f   : > { %v1029_v22 = vmul.f32 %v4024_v14, %v3079_v35  ;;  %v975_v49 = vadd.f32 %v2792_v60, %v925_v4  ;;  %v498_v28 = vadd.f32 %v2864_v30, %v2928_v21  ;;  %v4026_v48 = vstv %s4021_s10  ;;  %s4047_s10 = sld [smem:[#allocation78_spill]] }
 0x150   : > { %v1186_v58 = vmul.f32 %v4026_v48, %v3103_v59  ;;  %v924_v18 = vadd.f32 %v2743_v40, %v863_v50  ;;  %v870_v5 = vadd.f32 %v868_v13, %v806_v7  ;;  %v4027_v24 = vstv %s4002_s1  ;;  %s4035_s1 = sld [smem:[#allocation72_spill]] }
 0x151   : > { %v739_v27 = vmul.f32 %v4027_v24, %v2987_v53  ;;  %v1279_v0 = vsel %vm841_vm7, %v1276_v56, %v1278_v20  ;;  %v3143_v38 = vmul.f32 %v1280_v29, %v2500_v32  ;;  %v1025_v60 = vadd.f32 %v1023_v23, %v975_v49 }
 0x152   : > { %v562_v30 = vadd.f32 %v3002_v45, %v498_v28  ;;  %v3147_v21 = vmul.f32 %v1229_v63, %v2484_v26  ;;  %v974_v40 = vadd.f32 %v2815_v1, %v924_v18  ;;  %v4029_v25 = vmov %v4026_v48 }
 0x153   : > { %v1185_v13 = vmul.f32 %v4029_v25, %v3111_v8  ;;  %v931_v4 = vadd.f32 %v2748_v3, %v870_v5  ;;  %v4030_v9 = vrot.slane %v2529_v51, %v2272_v44  ;;  %v4032_v23 = vstv %s4025_s27  ;;  %s2076_s27 = smov 48  }
 0x154   : > { %v1236_v17 = vmul.f32 %v4032_v23, %v3126_v47  ;;  %v4033_v26 = vrot.slane %v2508_v37, %v2270_v43  ;;  %v4034_v1 = vstv %s4008_s30  ;;  %v3167_v20 = vmul.f32 %v1279_v0, %v2497_v31  ;;  %s4040_s30 = sld [smem:[#allocation74_spill]] }
 0x155   : > { %v1078_v32 = vadd.f32 %v4030_v9, %v1025_v60  ;;  %v803_v63 = vmul.f32 %v4034_v1, %v3015_v52  ;;  %v1024_v3 = vadd.f32 %v1022_v34, %v974_v40  ;;  %v981_v56 = vadd.f32 %v2820_v42, %v931_v4 }
 0x156   : > { %v627_v45 = vadd.f32 %v4033_v26, %v562_v30  ;;  %v4036_v50 = vstv %s3872_s19  ;;  %v4038_v29 = vstv %s4028_s8  ;;  %v505_v28 = vadd.f32 %v2886_v36, %v2938_v12  ;;  %s4043_s19 = sld [smem:[#allocation79_spill]] }
 0x157   : > { %v867_v7 = vmul.f32 %v4036_v50, %v3040_v6  ;;  %v1188_v14 = vadd.f32 %v1186_v58, %v1078_v32  ;;  %v1286_v37 = vmul.f32 %v4038_v29, %v3143_v38  ;;  %v4039_v31 = vrot.slane %v2529_v51, %v2270_v43  ;;  %s4061_s8 = sld [smem:[#allocation83_spill]] }
 0x158   : > { %v741_v49 = vadd.f32 %v739_v27, %v627_v45  ;;  %v4041_v48 = vmov %v4032_v23  ;;  %v1031_v18 = vadd.f32 %v1029_v22, %v981_v56  ;;  %v4042_v5 = vstv %s4031_s21  ;;  %s2077_s21 = smov 32  }
 0x159   : > { %v1077_v34 = vadd.f32 %v4039_v31, %v1024_v3  ;;  %v1235_v42 = vmul.f32 %v4041_v48, %v3147_v21  ;;  %v1192_v58 = vmul.f32 %v4042_v5, %v3103_v59  ;;  %v1238_v24 = vadd.f32 %v1236_v17, %v1188_v14 }
 0x15a   : > { %v805_v0 = vadd.f32 %v803_v63, %v741_v49  ;;  %v569_v27 = vadd.f32 %v3026_v2, %v505_v28  ;;  %v4044_v36 = vstv %s4035_s1  ;;  %v4045_v51 = vmov %v4038_v29  ;;  %s4067_s1 = sld [smem:[#allocation86_spill]] }
 0x15b   : > { %v746_v12 = vmul.f32 %v4044_v36, %v2976_v54  ;;  %v1187_v60 = vadd.f32 %v1185_v13, %v1077_v34  ;;  %v1285_v30 = vmul.f32 %v4045_v51, %v3167_v20  ;;  %v4046_v40 = vrot.slane %v2545_v15, %v2272_v44 }
 0x15c   : > { %v4048_v25 = vstv %s4037_s3  ;;  %v1288_v9 = vadd.f32 %v1286_v37, %v1238_v24  ;;  %v869_v32 = vadd.f32 %v867_v7, %v805_v0  ;;  %v4049_v2 = vrot.slane %v2539_v10, %v2272_v44  ;;  %s4076_s3 = sld [smem:[#allocation89_spill]] }
 0x15d   : > { %v1094_v22 = vadd.f32 %v4046_v40, %v1031_v18  ;;  %v1242_v4 = vmul.f32 %v4048_v25, %v3126_v47  ;;  %v4050_v13 = vstv %s4040_s30  ;;  %v1237_v26 = vadd.f32 %v1235_v42, %v1187_v60  ;;  %s4090_s30 = sld [smem:[#allocation85_spill]] }
 0x15e   : > { %v644_v23 = vadd.f32 %v4049_v2, %v569_v27  ;;  %v810_v17 = vmul.f32 %v4050_v13, %v2995_v61  ;;  %v4051_v1 = vstv %s4043_s19  ;;  %v504_v3 = vadd.f32 %v2878_v62, %v2934_v46  ;;  %1327 = vrot.lane.b32.xlu1 %v1288_v9, %s2076_s27  ;;  %v4070_v2 = vld [vmem:[#allocation134_spill] sm:$0xff]  ;;  %s4100_s19 = sld [smem:[#allocation88_spill]] }
 0x15f   : > { %v1194_v45 = vadd.f32 %v1192_v58, %v1094_v22  ;;  %v1292_v63 = vmul.f32 %v4051_v1, %v3143_v38  ;;  %v4052_v56 = vstv %s4010_s15  ;;  %v930_v7 = vadd.f32 %v2760_v41, %v869_v32  ;;  %s4058_s15 = sld [smem:[#allocation80_spill]] }
 0x160   : > { %v3214_v50 = vmul.f32 %v4052_v56, %v2916_v16  ;;  %v748_v14 = vadd.f32 %v746_v12, %v644_v23  ;;  %v4053_v29 = vstv %s4047_s10  ;;  %v1287_v49 = vadd.f32 %v1285_v30, %v1237_v26  ;;  %v4055_v16 = vld [vmem:[#allocation112_spill] sm:$0xff]  ;;  %s4104_s10 = sld [smem:[#allocation90_spill]] }
 0x161   : > { %v874_v37 = vmul.f32 %v4053_v29, %v3018_v39  ;;  %v1244_v28 = vadd.f32 %v1242_v4, %v1194_v45  ;;  %v568_v31 = vadd.f32 %v3010_v19, %v504_v3  ;;  %v4054_v62 = vmov %v4044_v36  ;;  %v4062_v36 = vld [vmem:[#allocation126_spill] sm:$0xff]  ;;  %v4063_v12 = vld [vmem:[#allocation120_spill] sm:$0xff] }
 0x162   : > { %v745_v46 = vmul.f32 %v4054_v62, %v2987_v53  ;;  %v980_v34 = vadd.f32 %v4055_v16, %v930_v7  ;;  %v4056_v48 = vstv %s4019_s25  ;;  %v4057_v41 = vmov %v4042_v5  ;;  %1325 = vrot.lane.b32.xlu0 %v1287_v49, %s2076_s27  ;;  %s4065_s25 = sld [smem:[#allocation82_spill]]  ;;  %v4080_v62 = vld [vmem:[#allocation125_spill] sm:$0xff] }
 0x163   : > { %v1028_v42 = vmul.f32 %v4056_v48, %v3076_v57  ;;  %v1191_v18 = vmul.f32 %v4057_v41, %v3111_v8  ;;  %v812_v5 = vadd.f32 %v810_v17, %v748_v14  ;;  %v1294_v58 = vadd.f32 %v1292_v63, %v1244_v28  ;;  %s4068_s27 = sld [smem:[#allocation84_spill]]  ;;  %v4082_v48 = vld [vmem:[#allocation113_spill] sm:$0xff] }
 0x164   : > { %v4059_v24 = vrot.slane %v2539_v10, %v2270_v43  ;;  %v4060_v0 = vmov %v4050_v13  ;;  %v517_v60 = vadd.f32 %v4063_v12, %v4062_v36  ;;  %v4064_v30 = vmov %v4048_v25 }
 0x165   : > { %v809_v27 = vmul.f32 %v4060_v0, %v3015_v52  ;;  %v1030_v51 = vadd.f32 %v1028_v42, %v980_v34  ;;  %v1241_v40 = vmul.f32 %v4064_v30, %v3147_v21  ;;  %v4066_v22 = vmov %v4051_v1  ;;  %1348 = vrot.lane.b32.xlu1 %v1294_v58, %s2077_s21  ;;  %v4073_v1 = vld [vmem:[#allocation105_spill] sm:$0xff] }
 0x166   : > { %v643_v19 = vadd.f32 %v4059_v24, %v568_v31  ;;  %v1291_v25 = vmul.f32 %v4066_v22, %v3167_v20  ;;  %v876_v4 = vadd.f32 %v874_v37, %v812_v5  ;;  %v4069_v9 = vmov %v4053_v29  ;;  %v4077_v37 = vld [vmem:[#allocation92_spill] sm:$0xff] }
 0x167   : > { %v873_v32 = vmul.f32 %v4069_v9, %v3040_v6  ;;  %v581_v23 = vadd.f32 %v4070_v2, %v517_v60  ;;  %v4071_v13 = vstv %s4058_s15  ;;  %v4072_v26 = vrot.slane %v2545_v15, %v2270_v43  ;;  %v4089_v9 = vld [vmem:[#allocation106_spill] sm:$0xff]  ;;  %s2078_s15 = smov 16  }
 0x168   : > { %v747_v10 = vadd.f32 %v745_v46, %v643_v19  ;;  %v758_v17 = vmul.f32 %v4071_v13, %v2976_v54  ;;  %v937_v63 = vadd.f32 %v4073_v1, %v876_v4  ;;  %v4074_v3 = vstv %s2394_s9  ;;  %v4081_v46 = vld [vmem:[#allocation119_spill] sm:$0xff]  ;;  %s4098_s9 = sld [smem:[#allocation87_spill]] }
 0x169   : > { %v1093_v45 = vadd.f32 %v4072_v26, %v1030_v51  ;;  %v1035_v56 = vmul.f32 %v4074_v3, %v3079_v35  ;;  %v4075_v7 = vstv %s4061_s8  ;;  %v4078_v49 = vrot.slane %v4077_v37, %v2272_v44 }
 0x16a   : > { %v1198_v14 = vmul.f32 %v4075_v7, %v3103_v59  ;;  %v811_v29 = vadd.f32 %v809_v27, %v747_v10  ;;  %v4079_v31 = vstv %s4065_s25  ;;  %v516_v16 = vadd.f32 %v4081_v46, %v4080_v62  ;;  %v4085_v27 = vld [vmem:[#allocation133_spill] sm:$0xff]  ;;  %s2082_s25 = smov [#allocation12]  }
 0x16b   : > { %v676_v28 = vadd.f32 %v4078_v49, %v581_v23  ;;  %v822_v15 = vmul.f32 %v4079_v31, %v2995_v61  ;;  %v1193_v34 = vadd.f32 %v1191_v18, %v1093_v45  ;;  %v987_v42 = vadd.f32 %v4082_v48, %v937_v63  ;;  %v4093_v45 = vld [vmem:[#allocation93_spill] sm:$0xff] }
 0x16c   : > { %v4083_v41 = vstv %s4067_s1  ;;  %v4084_v58 = vstv %s4068_s27  ;;  %v875_v19 = vadd.f32 %v873_v32, %v811_v29  ;;  %v580_v36 = vadd.f32 %v4085_v27, %v516_v16  ;;  %v4097_v29 = vld [vmem:[#allocation122_spill] sm:$0xff] }
 0x16d   : > { %v1248_v5 = vmul.f32 %v4083_v41, %v3126_v47  ;;  %v886_v24 = vmul.f32 %v4084_v58, %v3018_v39  ;;  %v760_v0 = vadd.f32 %v758_v17, %v676_v28  ;;  %v4086_v12 = vmov %v4071_v13  ;;  %v4099_v28 = vld [vmem:[#allocation114_spill] sm:$0xff] }
 0x16e   : > { %v757_v60 = vmul.f32 %v4086_v12, %v2987_v53  ;;  %v1243_v51 = vadd.f32 %v1241_v40, %v1193_v34  ;;  %v1037_v30 = vadd.f32 %v1035_v56, %v987_v42  ;;  %v4087_v18 = vstv %s4076_s3 }
 0x16f   : > { %v1298_v22 = vmul.f32 %v4087_v18, %v3143_v38  ;;  %v4088_v4 = vmov %v4074_v3  ;;  %v936_v2 = vadd.f32 %v4089_v9, %v875_v19  ;;  %v824_v32 = vadd.f32 %v822_v15, %v760_v0  ;;  %v4106_v0 = vld [vmem:[#allocation107_spill] sm:$0xff] }
 0x170   : > { %v1034_v10 = vmul.f32 %v4088_v4, %v3076_v57  ;;  %v4091_v23 = vrot.slane %v4077_v37, %v2270_v43  ;;  %v4092_v17 = vmov %v4079_v31  ;;  %v1293_v26 = vadd.f32 %v1291_v25, %v1243_v51  ;;  %v4108_v51 = vld [vmem:[#allocation94_spill] sm:$0xff] }
 0x171   : > { %v821_v40 = vmul.f32 %v4092_v17, %v3015_v52  ;;  %v4094_v1 = vrot.slane %v4093_v45, %v2272_v44  ;;  %v4095_v3 = vmov %v4075_v7  ;;  %v4096_v7 = vld [vmem:[#allocation128_spill] sm:$0xff]  ;;  %v986_v31 = vadd.f32 %v4099_v28, %v936_v2  ;;  %v4112_v2 = vld [vmem:[#allocation115_spill] sm:$0xff] }
 0x172   : > { %v675_v13 = vadd.f32 %v4091_v23, %v580_v36  ;;  %v1197_v56 = vmul.f32 %v4095_v3, %v3111_v8  ;;  %v523_v49 = vadd.f32 %v4097_v29, %v4096_v7  ;;  %v888_v37 = vadd.f32 %v886_v24, %v824_v32  ;;  %1346 = vrot.lane.b32.xlu0 %v1293_v26, %s2077_s21  ;;  %v4116_v3 = vld [vmem:[#allocation121_spill] sm:$0xff]  ;;  %s1979_s21 = sshll.u32 %s2082_s25, 4  ;;  %s1980_s21 = int_to_ptr.vmem [resolvable:$false] %s1979_s21 }
 0x173   : > { %v1110_v63 = vadd.f32 %v4094_v1, %v1037_v30  ;;  %v4101_v62 = vmov %v4084_v58  ;;  %v4102_v16 = vmov %v4083_v41  ;;  %v4103_v42 = vstv %s4090_s30  ;;  %s1981_s1 = scalar_lea.vmem %s1980_s21, 64 }
 0x174   : > { %v759_v15 = vadd.f32 %v757_v60, %v675_v13  ;;  %v885_v46 = vmul.f32 %v4101_v62, %v3040_v6  ;;  %v1247_v34 = vmul.f32 %v4102_v16, %v3147_v21  ;;  %v587_v48 = vadd.f32 %v3095_v33, %v523_v49 }
 0x175   : > { %v1200_v25 = vadd.f32 %v1198_v14, %v1110_v63  ;;  %v764_v41 = vmul.f32 %v4103_v42, %v2976_v54  ;;  %v1036_v58 = vadd.f32 %v1034_v10, %v986_v31  ;;  %v4105_v24 = vmov %v4087_v18  ;;  %v4115_v63 = vld [vmem:[#allocation127_spill] sm:$0xff]  ;;  %v4118_v31 = vld [vmem:[#allocation108_spill] sm:$0xff] }
 0x176   : > { %v1297_v19 = vmul.f32 %v4105_v24, %v3167_v20  ;;  %v949_v27 = vadd.f32 %v4106_v0, %v888_v37  ;;  %v823_v36 = vadd.f32 %v821_v40, %v759_v15  ;;  %v4107_v14 = vstv %s4098_s9  ;;  %v4124_v24 = vld [vmem:[#allocation116_spill] sm:$0xff] }
 0x177   : > { %v1250_v12 = vadd.f32 %v1248_v5, %v1200_v25  ;;  %v1047_v60 = vmul.f32 %v4107_v14, %v3079_v35  ;;  %v4109_v30 = vrot.slane %v4108_v51, %v2272_v44  ;;  %v4110_v18 = vstv %s4100_s19 }
 0x178   : > { %v828_v4 = vmul.f32 %v4110_v18, %v2995_v61  ;;  %v4111_v10 = vrot.slane %v4093_v45, %v2270_v43  ;;  %v999_v32 = vadd.f32 %v4112_v2, %v949_v27  ;;  %v4113_v23 = vstv %s2448_s24  ;;  %v4129_v2 = vld [vmem:[#allocation132_spill] sm:$0xff]  ;;  %s2079_s24 = smov 112  }
 0x179   : > { %v692_v33 = vadd.f32 %v4109_v30, %v587_v48  ;;  %v1210_v5 = vmul.f32 %v4113_v23, %v3103_v59  ;;  %v887_v13 = vadd.f32 %v885_v46, %v823_v36  ;;  %v1300_v17 = vadd.f32 %v1298_v22, %v1250_v12  ;;  %v4120_v46 = vld [vmem:[#allocation135_spill] sm:$0xff] }
 0x17a   : > { %v1109_v9 = vadd.f32 %v4111_v10, %v1036_v58  ;;  %v4114_v26 = vstv %s4104_s10  ;;  %v522_v7 = vadd.f32 %v4116_v3, %v4115_v63  ;;  %v1049_v45 = vadd.f32 %v1047_v60, %v999_v32  ;;  %v4130_v32 = vld [vmem:[#allocation124_spill] sm:$0xff] }
 0x17b   : > { %v766_v40 = vadd.f32 %v764_v41, %v692_v33  ;;  %v892_v1 = vmul.f32 %v4114_v26, %v3018_v39  ;;  %v4117_v49 = vstv %s2480_s26  ;;  %v948_v37 = vadd.f32 %v4118_v31, %v887_v13  ;;  %1372 = vrot.lane.b32.xlu1 %v1300_v17, %s2078_s15  ;;  %s4146_s26 = sld [smem:[#allocation51_spill]] }
 0x17c   : > { %v1199_v29 = vadd.f32 %v1197_v56, %v1109_v9  ;;  %v1260_v28 = vmul.f32 %v4117_v49, %v3126_v47  ;;  %v4119_v22 = vstv %s3896_s7  ;;  %v586_v25 = vadd.f32 %v4120_v46, %v522_v7  ;;  %s4154_s7 = sld [smem:[#allocation52_spill]] }
 0x17d   : > { %v1310_v15 = vmul.f32 %v4119_v22, %v3143_v38  ;;  %v830_v62 = vadd.f32 %v828_v4, %v766_v40  ;;  %v4121_v16 = vmov %v4103_v42  ;;  %v4122_v42 = vld [vmem:[#allocation95_spill] sm:$0xff]  ;;  %v998_v0 = vadd.f32 %v4124_v24, %v948_v37  ;;  %v4132_v40 = vld [vmem:[#allocation109_spill] sm:$0xff] }
 0x17e   : > { %v763_v48 = vmul.f32 %v4121_v16, %v2987_v53  ;;  %v1249_v56 = vadd.f32 %v1247_v34, %v1199_v29  ;;  %v4123_v41 = vrot.slane %v4122_v42, %v2272_v44  ;;  %v4125_v27 = vmov %v4107_v14  ;;  %v4137_v37 = vld [vmem:[#allocation117_spill] sm:$0xff] }
 0x17f   : > { %v1046_v36 = vmul.f32 %v4125_v27, %v3076_v57  ;;  %v4126_v12 = vmov %v4113_v23  ;;  %v894_v60 = vadd.f32 %v892_v1, %v830_v62  ;;  %v4127_v30 = vrot.slane %v4108_v51, %v2270_v43 }
 0x180   : > { %v1142_v58 = vadd.f32 %v4123_v41, %v1049_v45  ;;  %v1209_v14 = vmul.f32 %v4126_v12, %v3111_v8  ;;  %v4128_v34 = vmov %v4110_v18  ;;  %v1299_v4 = vadd.f32 %v1297_v19, %v1249_v56  ;;  %v4144_v12 = vld [vmem:[#allocation123_spill] sm:$0xff] }
 0x181   : > { %v691_v33 = vadd.f32 %v4127_v30, %v586_v25  ;;  %v827_v18 = vmul.f32 %v4128_v34, %v3015_v52  ;;  %v1048_v9 = vadd.f32 %v1046_v36, %v998_v0  ;;  %v529_v23 = vadd.f32 %v4130_v32, %v4129_v2  ;;  %v4143_v36 = vld [vmem:[#allocation131_spill] sm:$0xff]  ;;  %v4150_v2 = vld [vmem:[#allocation110_spill] sm:$0xff] }
 0x182   : > { %v1212_v10 = vadd.f32 %v1210_v5, %v1142_v58  ;;  %v4131_v13 = vmov %v4117_v49  ;;  %v955_v26 = vadd.f32 %v4132_v40, %v894_v60  ;;  %v4133_v51 = vstv %s4104_s10  ;;  %1370 = vrot.lane.b32.xlu0 %v1299_v4, %s2078_s15  ;;  %v4148_v4 = vld [vmem:[#allocation97_spill] sm:$0xff] }
 0x183   : > { %v1259_v17 = vmul.f32 %v4131_v13, %v3147_v21  ;;  %v765_v1 = vadd.f32 %v763_v48, %v691_v33  ;;  %v891_v63 = vmul.f32 %v4133_v51, %v3040_v6  ;;  %v4134_v19 = vrot.slane %v4122_v42, %v2270_v43  ;;  %v4139_v48 = vld [vmem:[#allocation96_spill] sm:$0xff] }
 0x184   : > { %v1262_v3 = vadd.f32 %v1260_v28, %v1212_v10  ;;  %v593_v7 = vadd.f32 %v3214_v50, %v529_v23  ;;  %v4135_v29 = vstv %s3899_s5  ;;  %v4136_v49 = vmov %v4119_v22 }
 0x185   : > { %v1141_v5 = vadd.f32 %v4134_v19, %v1048_v9  ;;  %v770_v45 = vmul.f32 %v4135_v29, %v2976_v54  ;;  %v1309_v31 = vmul.f32 %v4136_v49, %v3167_v20  ;;  %v1005_v22 = vadd.f32 %v4137_v37, %v955_v26 }
 0x186   : > { %v4138_v62 = vstv %s3898_s6  ;;  %v829_v28 = vadd.f32 %v827_v18, %v765_v1  ;;  %v1312_v25 = vadd.f32 %v1310_v15, %v1262_v3  ;;  %v4140_v56 = vrot.slane %v4139_v48, %v2272_v44  ;;  %s2080_s6 = smov 96  }
 0x187   : > { %v1053_v46 = vmul.f32 %v4138_v62, %v3079_v35  ;;  %v1211_v16 = vadd.f32 %v1209_v14, %v1141_v5  ;;  %v4141_v42 = vstv %s3901_s29  ;;  %v4142_v24 = vstv %s2524_s23  ;;  %v4155_v5 = vld [vmem:[#allocation118_spill] sm:$0xff] }
 0x188   : > { %v708_v50 = vadd.f32 %v4140_v56, %v593_v7  ;;  %v834_v41 = vmul.f32 %v4141_v42, %v2995_v61  ;;  %v1216_v0 = vmul.f32 %v4142_v24, %v3103_v59  ;;  %v893_v27 = vadd.f32 %v891_v63, %v829_v28  ;;  %1413 = vrot.lane.b32.xlu1 %v1312_v25, %s2079_s24  ;;  %v4161_v25 = vld [vmem:[#allocation101_spill] sm:$0xff] }
 0x189   : > { %v1055_v58 = vadd.f32 %v1053_v46, %v1005_v22  ;;  %v528_v60 = vadd.f32 %v4144_v12, %v4143_v36  ;;  %v1261_v15 = vadd.f32 %v1259_v17, %v1211_v16  ;;  %v4145_v14 = vstv %s2556_s14 }
 0x18a   : > { %v1266_v30 = vmul.f32 %v4145_v14, %v3126_v47  ;;  %v772_v33 = vadd.f32 %v770_v45, %v708_v50  ;;  %v4147_v34 = vstv %s2550_s28  ;;  %v4149_v10 = vrot.slane %v4148_v4, %v2272_v44 }
 0x18b   : > { %v898_v18 = vmul.f32 %v4147_v34, %v3018_v39  ;;  %v954_v32 = vadd.f32 %v4150_v2, %v893_v27  ;;  %v592_v23 = vadd.f32 %v3100_v11, %v528_v60  ;;  %v4151_v13 = vmov %v4135_v29  ;;  %v4167_v60 = vld [vmem:[#allocation111_spill] sm:$0xff] }
 0x18c   : > { %v1158_v9 = vadd.f32 %v4149_v10, %v1055_v58  ;;  %v769_v17 = vmul.f32 %v4151_v13, %v2987_v53  ;;  %v1311_v40 = vadd.f32 %v1309_v31, %v1261_v15  ;;  %v4152_v26 = vstv %s2580_s13  ;;  %v4173_v13 = vld [vmem:[#allocation99_spill] sm:$0xff]  ;;  %s4196_s13 = sld [smem:[#allocation63_spill]] }
 0x18d   : > { %v1316_v1 = vmul.f32 %v4152_v26, %v3143_v38  ;;  %v4153_v51 = vmov %v4138_v62  ;;  %v836_v3 = vadd.f32 %v834_v41, %v772_v33  ;;  %v1004_v7 = vadd.f32 %v4155_v5, %v954_v32  ;;  %v4159_v62 = vld [vmem:[#allocation103_spill] sm:$0xff]  ;;  %v4177_v5 = vld [vmem:[#allocation104_spill] sm:$0xff] }
 0x18e   : > { %v1052_v63 = vmul.f32 %v4153_v51, %v3076_v57  ;;  %v1218_v19 = vadd.f32 %v1216_v0, %v1158_v9  ;;  %v4156_v11 = vrot.slane %v4139_v48, %v2270_v43  ;;  %v4157_v45 = vmov %v4141_v42  ;;  %1411 = vrot.lane.b32.xlu0 %v1311_v40, %s2079_s24 }
 0x18f   : > { %v833_v49 = vmul.f32 %v4157_v45, %v3015_v52  ;;  %v4158_v31 = vstv %s4146_s26  ;;  %v900_v22 = vadd.f32 %v898_v18, %v836_v3  ;;  %v4160_v46 = vstv %s2573_s2  ;;  %s3496_s2 = sld [smem:[#allocation8 + $0x4c]] }
 0x190   : > { %v707_v29 = vadd.f32 %v4156_v11, %v592_v23  ;;  %v751_v37 = vmul.f32 %v4158_v31, %v2987_v53  ;;  %v1009_v28 = vmul.f32 %v4160_v46, %v4159_v62  ;;  %v4162_v16 = vstv %s2564_s0  ;;  %v4172_v23 = vld [vmem:[#allocation129_spill] sm:$0xff]  ;;  %s4207_s0 = sld [smem:[#allocation140_spill]] }
 0x191   : > { %v958_v56 = vmul.f32 %v4162_v16, %v4161_v25  ;;  %v1268_v50 = vadd.f32 %v1266_v30, %v1218_v19  ;;  %v1054_v48 = vadd.f32 %v1052_v63, %v1004_v7  ;;  %v4163_v41 = vmov %v4147_v34 }
 0x192   : > { %v771_v42 = vadd.f32 %v769_v17, %v707_v29  ;;  %v897_v58 = vmul.f32 %v4163_v41, %v3040_v6  ;;  %v4164_v24 = vmov %v4158_v31  ;;  %v4165_v0 = vstv %s4154_s7 }
 0x193   : > { %v752_v53 = vmul.f32 %v4164_v24, %v2976_v54  ;;  %v815_v27 = vmul.f32 %v4165_v0, %v3015_v52  ;;  %v4166_v36 = vstv %s2524_s23  ;;  %v961_v15 = vadd.f32 %v4167_v60, %v900_v22 }
 0x194   : > { %v1215_v12 = vmul.f32 %v4166_v36, %v3111_v8  ;;  %v1318_v14 = vadd.f32 %v1316_v1, %v1268_v50  ;;  %v4168_v30 = vrot.slane %v4148_v4, %v2270_v43  ;;  %v4169_v34 = vstv %s2556_s14  ;;  %s3479_s14 = sld [smem:[#allocation8 + $0x4b]]  ;;  %v4181_v50 = vld [vmem:[#allocation98_spill] sm:$0xff] }
 0x195   : > { %v1265_v18 = vmul.f32 %v4169_v34, %v3147_v21  ;;  %v835_v10 = vadd.f32 %v833_v49, %v771_v42  ;;  %v4170_v54 = vmov %v4165_v0  ;;  %v1011_v52 = vadd.f32 %v1009_v28, %v961_v15 }
 0x196   : > { %v1157_v33 = vadd.f32 %v4168_v30, %v1054_v48  ;;  %v816_v9 = vmul.f32 %v4170_v54, %v2995_v61  ;;  %v4171_v2 = vstv %s2588_s11  ;;  %v4174_v17 = vrot.slane %v4173_v13, %v2270_v43  ;;  %1437 = vrot.lane.b32.xlu1 %v1318_v14, %s2080_s6  ;;  %v4175_v61 = vld [vmem:[#allocation130_spill] sm:$0xff] }
 0x197   : > { %v1059_v32 = vmul.f32 %v4171_v2, %v3079_v35  ;;  %v1315_v1 = vmul.f32 %v4152_v26, %v3167_v20  ;;  %v899_v51 = vadd.f32 %v897_v58, %v835_v10  ;;  %v4176_v63 = vrot.slane %v4173_v13, %v2272_v44 }
 0x198   : > { %v659_v40 = vadd.f32 %v4174_v17, %v4172_v23  ;;  %v1217_v4 = vadd.f32 %v1215_v12, %v1157_v33  ;;  %v4178_v7 = vmov %v4160_v46  ;;  %v4179_v45 = vstv %s2628_s17 }
 0x199   : > { %v660_v3 = vadd.f32 %v4176_v63, %v4175_v61  ;;  %v1061_v19 = vadd.f32 %v1059_v32, %v1011_v52  ;;  %v1008_v11 = vmul.f32 %v4178_v7, %v4177_v5  ;;  %v879_v49 = vmul.f32 %v4179_v45, %v3040_v6 }
 0x19a   : > { %v753_v29 = vadd.f32 %v751_v37, %v659_v40  ;;  %v1267_v31 = vadd.f32 %v1265_v18, %v1217_v4  ;;  %v960_v22 = vadd.f32 %v958_v56, %v899_v51  ;;  %v4180_v28 = vmov %v4179_v45  ;;  %v4188_v18 = vld [vmem:[#allocation102_spill] sm:$0xff] }
 0x19b   : > { %v754_v46 = vadd.f32 %v752_v53, %v660_v3  ;;  %v880_v16 = vmul.f32 %v4180_v28, %v3018_v39  ;;  %v4182_v48 = vrot.slane %v4181_v50, %v2272_v44  ;;  %v4183_v41 = vstv %s2613_s18 }
 0x19c   : > { %v1222_v37 = vmul.f32 %v4183_v41, %v3103_v59  ;;  %v4184_v6 = vstv %s2655_s16  ;;  %v817_v24 = vadd.f32 %v815_v27, %v753_v29  ;;  %v1317_v0 = vadd.f32 %v1315_v1, %v1267_v31  ;;  %s2081_s16 = smov 80  }
 0x19d   : > { %v1174_v42 = vadd.f32 %v4182_v48, %v1061_v19  ;;  %v1272_v58 = vmul.f32 %v4184_v6, %v3126_v47  ;;  %v1010_v36 = vadd.f32 %v1008_v11, %v960_v22  ;;  %v4185_v56 = vmov %v4171_v2 }
 0x19e   : > { %v1058_v53 = vmul.f32 %v4185_v56, %v3076_v57  ;;  %v818_v39 = vadd.f32 %v816_v9, %v754_v46  ;;  %v4186_v60 = vstv %s2667_s22  ;;  %v881_v14 = vadd.f32 %v879_v49, %v817_v24  ;;  %1435 = vrot.lane.b32.xlu0 %v1317_v0, %s2080_s6  ;;  %v4190_v9 = vld [vmem:[#allocation100_spill] sm:$0xff] }
 0x19f   : > { %v1224_v12 = vadd.f32 %v1222_v37, %v1174_v42  ;;  %v1322_v15 = vmul.f32 %v4186_v60, %v3143_v38  ;;  %v4187_v30 = vstv %s2637_s12  ;;  %v1122_v52 = vrot.slane %v4190_v9, %v2272_v44 }
 0x1a0   : > { %v940_v27 = vmul.f32 %v4187_v30, %v4161_v25  ;;  %v1060_v33 = vadd.f32 %v1058_v53, %v1010_v36  ;;  %v882_v34 = vadd.f32 %v880_v16, %v818_v39  ;;  %v4189_v10 = vmov %v4187_v30 }
 0x1a1   : > { %v941_v54 = vmul.f32 %v4189_v10, %v4188_v18  ;;  %v1274_v2 = vadd.f32 %v1272_v58, %v1224_v12  ;;  %v4191_v23 = vstv %s2646_s20  ;;  %v4193_v40 = vrot.slane %v4181_v50, %v2270_v43  ;;  %v1378_v18 = vld [vmem:[#allocation11 + $0x2] ss:$8 sm:$0x3]  ;;  %s4204_s20 = sld [smem:[#allocation20_spill]] }
 0x1a2   : > { %v942_v32 = vadd.f32 %v940_v27, %v881_v14  ;;  %v990_v13 = vmul.f32 %v4191_v23, %v4177_v5  ;;  %v4192_v25 = vmov %v4191_v23  ;;  %v4194_v26 = vmov %v4183_v41 }
 0x1a3   : > { %v991_v17 = vmul.f32 %v4192_v25, %v4159_v62  ;;  %v1173_v4 = vadd.f32 %v4193_v40, %v1060_v33  ;;  %v1221_v1 = vmul.f32 %v4194_v26, %v3111_v8  ;;  %v4195_v51 = vmov %v4184_v6  ;;  %v1354_v33 = vld [vmem:[#allocation11 + $0x1] ss:$8 sm:$0x3] }
 0x1a4   : > { %v1271_v61 = vmul.f32 %v4195_v51, %v3147_v21  ;;  %v943_v63 = vadd.f32 %v941_v54, %v882_v34  ;;  %v1324_v3 = vadd.f32 %v1322_v15, %v1274_v2  ;;  %v992_v19 = vadd.f32 %v990_v13, %v942_v32  ;;  %v1332_v34 = vld [vmem:[#allocation11] ss:$8 sm:$0x3] }
 0x1a5   : > { %v4197_v5 = vstv %s2661_s4  ;;  %v1252_v11 = vstv %s3479_s14  ;;  %v1223_v62 = vadd.f32 %v1221_v1, %v1173_v4  ;;  %v4198_v29 = vmov %v4186_v60  ;;  %v1395_v1 = vld [vmem:[#allocation11 + $0x3] ss:$8 sm:$0x3]  ;;  %s4203_s4 = sld [smem:[#allocation27_spill]] }
 0x1a6   : > { %v1040_v7 = vmul.f32 %v4197_v5, %v3076_v57  ;;  %v1321_v45 = vmul.f32 %v4198_v29, %v3167_v20  ;;  %v993_v49 = vadd.f32 %v991_v17, %v943_v63  ;;  %v4199_v31 = vmov %v4197_v5  ;;  %1461 = vrot.lane.b32.xlu1 %v1324_v3, %s2081_s16  ;;  %v1419_v5 = vld [vmem:[#allocation11 + $0x4] ss:$8 sm:$0x3] }
 0x1a7   : > { %v1041_v22 = vmul.f32 %v4199_v31, %v3079_v35  ;;  %v1273_v28 = vadd.f32 %v1271_v61, %v1223_v62  ;;  %v1302_v50 = vstv %s3496_s2  ;;  %v4200_v48 = vrot.slane %v4190_v9, %v2270_v43  ;;  %s1764_s29 = sshll.u32 %s4204_s20, 5 }
 0x1a8   : > { %v1042_v46 = vadd.f32 %v1040_v7, %v992_v19  ;;  %v4201_v42 = vstv %s4196_s13  ;;  %v1253_v37 = vmul.f32 %v1252_v11, %v3147_v21  ;;  %v1254_v0 = vmul.f32 %v1252_v11, %v3126_v47  ;;  %s1531_s17 = scalar_lea.hbm %s4207_s0, %s1764_s29 }
 0x1a9   : > { %v1043_v16 = vadd.f32 %v1041_v22, %v993_v49  ;;  %v1203_v41 = vmul.f32 %v4201_v42, %v3111_v8  ;;  %v1323_v6 = vadd.f32 %v1321_v45, %v1273_v28  ;;  %v4202_v24 = vmov %v4201_v42  ;;  %v1443_v49 = vld [vmem:[#allocation11 + $0x5] ss:$8 sm:$0x3] }
 0x1aa   : > { %v1125_v57 = vadd.f32 %v4200_v48, %v1042_v46  ;;  %v1204_v35 = vmul.f32 %v4202_v24, %v3103_v59  ;;  %v1303_v56 = vmul.f32 %v1302_v50, %v3167_v20  ;;  %v1304_v39 = vmul.f32 %v1302_v50, %v3143_v38  ;;  %v1467_v24 = vld [vmem:[#allocation11 + $0x6] ss:$8 sm:$0x3] }
 0x1ab   : > { %v1126_v58 = vadd.f32 %v1122_v52, %v1043_v16  ;;  %1459 = vrot.lane.b32.xlu0 %v1323_v6, %s2081_s16  ;;  %v1359_v20 = vrot.slane %v1354_v33, %v2270_v43  ;;  %v1363_v38 = vrot.slane %v1354_v33, %v2272_v44  ;;  %v1337_v9 = vrot.slane %v1332_v34, %v2270_v43  ;;  %s1660_s28 = sshll.u32 %s4203_s4, 1  ;;  %s1519_s5 = scalar_lea.sflag [#allocation6], %s4203_s4 }
 0x1ac   : > { %v1205_v36 = vadd.f32 %v1203_v41, %v1125_v57  ;;  %v1341_v52 = vrot.slane %v1332_v34, %v2272_v44  ;;  %v1383_v2 = vrot.slane %v1378_v18, %v2270_v43  ;;  %v1387_v32 = vrot.slane %v1378_v18, %v2272_v44  ;;  %s268_s11 = scalar_lea.vmem [#allocation12], %s1660_s28 }
 0x1ad   : > { %v1206_v53 = vadd.f32 %v1204_v35, %v1126_v58  ;;  %v1400_v7 = vrot.slane %v1395_v1, %v2270_v43  ;;  %v1404_v29 = vrot.slane %v1395_v1, %v2272_v44  ;;  %v1424_v45 = vrot.slane %v1419_v5, %v2270_v43  ;;  %s1533_s12 = sshll.u32 %s268_s11, 4  ;;  %s1534_s12 = int_to_ptr.vmem [resolvable:$true] %s1533_s12 }
 0x1ae   : > { %v1255_v12 = vadd.f32 %v1253_v37, %v1205_v36  ;;  %v1428_v46 = vrot.slane %v1419_v5, %v2272_v44  ;;  %v1448_v41 = vrot.slane %v1443_v49, %v2270_v43  ;;  %v1452_v37 = vrot.slane %v1443_v49, %v2272_v44  ;;  %s1975_s8 = scalar_lea.vmem %s1534_s12, 32  ;;  %p1982_p7 = scmp.lt.s32.totalorder %s1534_s12, %s1980_s21 }
 0x1af   : > { %v1256_v60 = vadd.f32 %v1254_v0, %v1206_v53  ;;  %p1976_p3 = scmp.ne.s32.totalorder %s1534_s12, %s1975_s8  ;;  %p1983_p6 = scmp.lt.s32.totalorder %s1981_s1, %s1975_s8 }
 0x1b0   : > { %v1305_v15 = vadd.f32 %v1303_v56, %v1255_v12 }
 0x1b1   : > { %v1306_v8 = vadd.f32 %v1304_v39, %v1256_v60  ;;  %v1472_v60 = vrot.slane %v1467_v24, %v2270_v43  ;;  %p1977_p11 = pnand %p1976_p3, %p2208_p13  ;;  %p1984_p1 = por %p1983_p6, %p1982_p7 }
 0x1b2   : > { %v1407_v57 = vmul.f32 %v1400_v7, %v1305_v15  ;;  %v1476_v15 = vrot.slane %v1467_v24, %v2272_v44 }
 0x1b3   : > { %v1408_v42 = vmul.f32 %v1404_v29, %v1306_v8  ;;  %p1978_p5 = pneg %p1977_p11 }
 0x1b5   : > { %p1985_p10 = pnand %p1984_p1, %p1978_p5 }
 0x1d0   : > { %v1328_v14 = vpop.permute.xlu1 %1327 }
 0x1d4   : > { %v1326_v21 = vpop.permute.xlu0 %1325 }
 0x1d5   : > { %v1330_v23 = vsel %vm1329_vm9, %v1326_v21, %v1328_v14  ;;  %v1331_v13 = vsel %vm1329_vm9, %v1328_v14, %v1326_v21 }
 0x1d6   : > { %v1344_v61 = vmul.f32 %v1337_v9, %v1331_v13  ;;  %v1345_v63 = vmul.f32 %v1341_v52, %v1330_v23  ;;  %v4206_v13 = vld [vmem:[#allocation28_spill] sm:$0xff] }
 0x1d7   : > { %v1349_v30 = vpop.permute.xlu1 %1348 }
 0x1e4   : > { %v1347_v27 = vpop.permute.xlu0 %1346 }
 0x1e5   : > { %v1351_v10 = vsel %vm1350_vm8, %v1347_v27, %v1349_v30  ;;  %v1352_v54 = vsel %vm1350_vm8, %v1349_v30, %v1347_v27 }
 0x1e6   : > { %v1366_v40 = vmul.f32 %v1359_v20, %v1352_v54  ;;  %v1367_v4 = vmul.f32 %v1363_v38, %v1351_v10 }
 0x1e8   : > { %v1368_v11 = vadd.f32 %v1366_v40, %v1344_v61  ;;  %v1369_v62 = vadd.f32 %v1367_v4, %v1345_v63 }
 0x1ed   : > { %v1373_v59 = vpop.permute.xlu1 %1372 }
 0x1f4   : > { %v1371_v47 = vpop.permute.xlu0 %1370 }
 0x1f5   : > { %v1375_v25 = vsel %vm1374_vm10, %v1371_v47, %v1373_v59  ;;  %v1376_v17 = vsel %vm1374_vm10, %v1373_v59, %v1371_v47 }
 0x1f6   : > { %v1390_v3 = vmul.f32 %v1383_v2, %v1376_v17  ;;  %v1391_v19 = vmul.f32 %v1387_v32, %v1375_v25 }
 0x1f8   : > { %v1392_v31 = vadd.f32 %v1390_v3, %v1368_v11  ;;  %v1393_v22 = vadd.f32 %v1391_v19, %v1369_v62 }
 0x1fa   : > { %v1414_v26 = vpop.permute.xlu1 %1413  ;;  %v1409_v35 = vadd.f32 %v1407_v57, %v1392_v31  ;;  %v1410_v0 = vadd.f32 %v1408_v42, %v1393_v22 }
 0x200   : > { %v1412_v51 = vpop.permute.xlu0 %1411 }
 0x201   : > { %v1416_v50 = vsel %vm1415_vm11, %v1412_v51, %v1414_v26  ;;  %v1417_v48 = vsel %vm1415_vm11, %v1414_v26, %v1412_v51 }
 0x202   : > { %v1431_v36 = vmul.f32 %v1424_v45, %v1416_v50  ;;  %v1432_v56 = vmul.f32 %v1428_v46, %v1417_v48 }
 0x204   : > { %v1433_v8 = vadd.f32 %v1431_v36, %v1409_v35  ;;  %v1434_v14 = vadd.f32 %v1432_v56, %v1410_v0 }
 0x208   : > { %v1438_v28 = vpop.permute.xlu1 %1437 }
 0x210   : > { %v1436_v16 = vpop.permute.xlu0 %1435 }
 0x211   : > { %v1440_v6 = vsel %vm1439_vm12, %v1436_v16, %v1438_v28  ;;  %v1441_v58 = vsel %vm1439_vm12, %v1438_v28, %v1436_v16 }
 0x212   : > { %v1455_v53 = vmul.f32 %v1448_v41, %v1440_v6  ;;  %v1456_v39 = vmul.f32 %v1452_v37, %v1441_v58 }
 0x214   : > { %v1457_v33 = vadd.f32 %v1455_v53, %v1433_v8  ;;  %v1458_v59 = vadd.f32 %v1456_v39, %v1434_v14 }
 0x218   : > { %v1462_v12 = vpop.permute.xlu1 %1461 }
 0x21d   : > { %v1460_v21 = vpop.permute.xlu0 %1459 }
 0x21e   : > { %v1464_v30 = vsel %vm1463_vm13, %v1460_v21, %v1462_v12  ;;  %v1465_v27 = vsel %vm1463_vm13, %v1462_v12, %v1460_v21 }
 0x21f   : > { %v1479_v47 = vmul.f32 %v1472_v60, %v1464_v30  ;;  %v1480_v34 = vmul.f32 %v1476_v15, %v1465_v27 }
 0x221   : > { %v1481_v18 = vadd.f32 %v1479_v47, %v1457_v33  ;;  %v1482_v20 = vadd.f32 %v1480_v34, %v1458_v59 }
 0x223   : > { %v1483_v55 = vsub.f32 0.0, %v1481_v18  ;;  %v1484_v38 = vsub.f32 0.0, %v1482_v20 }
 0x225   : > { %v1485_v10 = vmul.f32 1.442695, %v1483_v55  ;;  %v1487_v54 = vmul.f32 1.442695, %v1484_v38 }
 0x227   : > { %1872 = vpow2.f32 %v1485_v10 }
 0x228   : > { %1874 = vpow2.f32 %v1487_v54 }
 0x234   : > { %v1873_v43 = vpop.eup %1872 }
 0x235   : > { %v1875_v44 = vpop.eup %1874  ;;  %v1489_v9 = vadd.f32 1.0, %v1873_v43 }
 0x236   : > { %v1490_v52 = vadd.f32 1.0, %v1875_v44 }
 0x237   : > { %1876 = vrcp.f32 %v1489_v9 }
 0x238   : > { %1878 = vrcp.f32 %v1490_v52 }
 0x244   : > { %v1877_v2 = vpop.eup %1876 }
 0x245   : > { %v1879_v32 = vpop.eup %1878 }
 0x246   : > { %v1497_v23 = vcombine.low %v1877_v2, %v1879_v32 }
 0x248   : > { %v1504_v25 = vrot.slane %v1497_v23, %v4206_v13 }
 0x24a   : > { %v1511_v17 = vrot.slane %v1504_v25, %v4206_v13 }
 0x24c   : > { %1517 = vst.msk [vmem:[%s268_s11] sm:$0x3] %vm2259_vm1, %v1511_v17 }
 0x24d   : > { %1988 = shalt.err (!%p1985_p10)
}
 0x24e   : > { %s1989_s27 = scalar_lea.hbm %s1531_s17, 32  ;;  %s1993_s9 = scalar_lea.hbm %s4207_s0, 64 }
 0x24f   : > { %p1990_p2 = scmp.ne.s32.totalorder %s1531_s17, %s1989_s27  ;;  %p1994_p12 = scmp.lt.s32.totalorder %s1531_s17, %s4207_s0 }
 0x250   : > { %p1995_p0 = scmp.lt.s32.totalorder %s1993_s9, %s1989_s27 }
 0x251   : > { %p1991_p4 = pnand %p1990_p2, %p2208_p13 }
 0x252   : > { %p1996_p9 = por %p1995_p0, %p1994_p12 }
 0x253   : > { %p1992_p8 = pneg %p1991_p4 }
 0x255   : > { %p1997_p3 = pnand %p1996_p9, %p1992_p8 }
 0x257   : > { %2000 = shalt.err (!%p1997_p3)
}
 0x258   : > { %1779 = dma.vmem_to_hbm [thread:$0]  (%p2208_p13), %s1534_s12, 32, %s1531_s17, %s1519_s5  }
 0x259 PF: > { %s4209_s15 = sld [smem:[#allocation17_spill]] }
 0x25a   : > { %s4210_s24 = sld [smem:[#allocation23_spill]] }
 0x25b   : > { %s4211_s26 = sld [smem:[#allocation22_spill]] }
 0x25f   : > { %s1545_s7 = sand.u32 1, %s4209_s15  }
 0x260   : > { %p4212_p11 = scmp.ne.s32.totalorder %s4210_s24, 0  ;;  %s1546_s6 = scalar_lea.sflag [#allocation6], %s1545_s7 }
 0x261   : > { %p4213_p5 = scmp.ge.s32.totalorder %s4211_s26, 2 }
 0x263   : > { %p1796_p7 = pnand %p4213_p5, %p4212_p11 }
 0x265   : > { %p1797_p6 = pneg %p1796_p7 }
 0x267   : > { %2038 = dma.done.wait (%p1797_p6), %s1546_s6, 32  }
 0x268   : > { %2040 = vsyncadd (%p1797_p6), %s1546_s6, 4294967264  ;;  %s22_s20 = sadd.s32 1, %s4211_s26   ;;  %s4214_s15 = sld [smem:[#allocation18_spill]] }
 0x269   : > { %p19_p1 = scmp.ge.s32.totalorder %s22_s20, 4   ;;  %s4215_s16 = sld [smem:[#allocation19_spill]] }
 0x26a   : > { %s4216_s17 = sld [smem:[#allocation26_spill]] }
 0x26b   : > { %s4217_s18 = sld [smem:[#allocation21_spill]]  ;;  %21 = sbr.rel (!%p19_p1) target bundleno = 14 (0xe), region = 118 }
 0x26c   : > { %s4218_s19 = sld [smem:[#allocation25_spill]] }
 0x270   :  { %1551 = vsyncpa [#allocation5], 1 }
 0x271   :  { %1553 = vsyncpa [#allocation5 + $0x1], 1 }
 0x272   :  { %1554 = vsyncpa [#allocation10], 1 }
 0x273   :  { %1555 = vsyncpa [#allocation6], 1 }
 0x274   :  { %1557 = vsyncpa [#allocation6 + $0x1], 1 }
 0x275   :  { %1558 = vsyncpa [#allocation7], 1 }
 0x276   :  { %1560 = vsyncpa [#allocation7 + $0x1], 1 }

</bundles_post_ra>
